<compile_context>
chip_gen: v5e
topology: v5e:2x2
jax: 0.10.0
libtpu: 0.0.40
codegen_flags: <defaults>
</compile_context>

<pallas_src>
import functools

import jax
import jax.numpy as jnp
from jax.experimental import pallas as pl
from jax.experimental.pallas import tpu as pltpu


# ---------------------------------------------------------------------------
# helpers
# ---------------------------------------------------------------------------
def _round_up(n, m):
    return ((n + m - 1) // m) * m


def _pad_axis(arr, axis, target):
    pad = target - arr.shape[axis]
    if pad <= 0:
        return arr
    widths = [(0, 0)] * arr.ndim
    widths[axis] = (0, pad)
    return jnp.pad(arr, widths)


def build_dense_adjacency(n, edge_index, edge_weight):
    """Dense propagation matrix A (row = destination, col = source)."""
    src, dst = edge_index[0], edge_index[1]
    return jnp.zeros((n, n), jnp.float32).at[dst, src].add(edge_weight)


def _choose_graphs_per_step(num_graphs, np_, target_rows=256):
    """Largest divisor of G such that (a) grid keeps >=2 steps when G>=2 and
    (b) stacked M = Gb*Np reaches ~256 rows (fills the v6e/v7x MXU tile)."""
    best = 1
    for gb in range(1, num_graphs + 1):
        if num_graphs % gb != 0:
            continue
        if num_graphs >= 2 and num_graphs // gb < 2:
            continue
        best = gb
        if gb * np_ >= target_rows:
            break
    return best


def _vmem_limit_bytes(gb, np_, cp, hp, op, embed_bytes):
    """Explicit VMEM budget (double-buffered blocks + live temps), capped at
    the 64 MiB physical VMEM of a v7x TensorCore."""
    rows = gb * np_
    a_blk = gb * np_ * np_ * 2                      # bf16 A
    x_blk = rows * cp * 2                           # bf16 x
    e_blk = rows * op * embed_bytes                 # embed out
    g_blk = gb * op * 4                             # pooled out
    w_blk = (cp * hp + 2 * hp * op) * 2 + (hp + 2 * op) * 4
    pipelined = 2 * (a_blk + x_blk + e_blk + g_blk + w_blk)
    temps = rows * (hp * (4 + 4 + 2) + op * (2 + 4))  # z1/h (f32), h_b/t2_b, e
    est = pipelined + temps
    return int(min(max(2 * est, 32 * 1024 * 1024), 64 * 1024 * 1024))


# ---------------------------------------------------------------------------
# kernel: one grid step == a block of `gb` graphs
# ---------------------------------------------------------------------------
def gcn_kernel(a_ref, x_ref, w1_ref, b1_ref, w2_ref, b2_ref, w3_ref, b3_ref,
               embed_ref, gpool_ref, *, gb, np_, true_n):
    x = x_ref[...]                                        # (Gb*Np, Cp) bf16

    # conv1 feature transform: one stacked MXU matmul over all graphs.
    z1 = jnp.dot(x, w1_ref[...], preferred_element_type=jnp.float32)
    z1_b = z1.astype(jnp.bfloat16)                        # (Gb*Np, Hp)

    # Per-graph aggregation h_g = A_g @ z1_g (short static loop, tile-aligned
    # static slices), then fused bias + relu epilogue in f32 on the VPU.
    h_parts = []
    for g in range(gb):
        a_g = a_ref[g]                                    # (Np, Np) bf16
        h_parts.append(
            jnp.dot(a_g, z1_b[g * np_:(g + 1) * np_, :],
                    preferred_element_type=jnp.float32))
    h = jnp.concatenate(h_parts, axis=0) if gb > 1 else h_parts[0]
    h = jnp.maximum(h + b1_ref[...], 0.0)                 # f32 VPU epilogue
    h_b = h.astype(jnp.bfloat16)                          # (Gb*Np, Hp)

    # conv2 feature transform: one stacked MXU matmul.
    t2 = jnp.dot(h_b, w2_ref[...], preferred_element_type=jnp.float32)
    t2_b = t2.astype(jnp.bfloat16)                        # (Gb*Np, Op)

    # Per-graph: embed_g = A_g @ t2_g + b2 (lane-dense store), and the pooled
    # branch via  sum_i[A@(h@W3)+b3]_i = ((1^T A) @ h) @ W3 + N*b3.
    pooled_parts = []
    for g in range(gb):
        a_g = a_ref[g]
        e_g = jnp.dot(a_g, t2_b[g * np_:(g + 1) * np_, :],
                      preferred_element_type=jnp.float32)
        embed_ref[pl.ds(g * np_, np_), :] = (e_g + b2_ref[...]).astype(embed_ref.dtype)
        # Column sum of A on the XLU (f32 accumulation); padded columns are 0,
        # so padded h rows never contribute to the pooled result.
        a_colsum = jnp.sum(a_g.astype(jnp.float32), axis=0, keepdims=True)
        pooled_parts.append(
            jnp.dot(a_colsum.astype(jnp.bfloat16),
                    h_b[g * np_:(g + 1) * np_, :],
                    preferred_element_type=jnp.float32))  # (1, Hp)
    pooled_h = (jnp.concatenate(pooled_parts, axis=0)
                if gb > 1 else pooled_parts[0])           # (Gb, Hp) f32
    g3 = jnp.dot(pooled_h.astype(jnp.bfloat16), w3_ref[...],
                 preferred_element_type=jnp.float32)      # (Gb, Op)
    gpool_ref[0] = (g3 + float(true_n) * b3_ref[...]).astype(gpool_ref.dtype)


# ---------------------------------------------------------------------------
# wrappers
# ---------------------------------------------------------------------------
def gcn_forward_batched(adj, x, params, *, embed_dtype=jnp.bfloat16,
                        graphs_per_step=None):
    """adj: [G, N, N] dense weighted adjacency (dst, src); x: [G, N, C_in].

    NOTE: all graphs in the batch share the same true node count N (that is
    how this wrapper constructs them); the pooled N*b3 term assumes it.
    """
    G, N, _ = adj.shape
    c_in = x.shape[-1]
    hidden = params["w1"].shape[1]
    out_c = params["w2"].shape[1]

    LANE = 128
    np_ = _round_up(N, LANE)       # lane-dense node dim (A's last dim = lanes)
    cp = _round_up(c_in, LANE)     # lane-dense channel dims
    hp = _round_up(hidden, LANE)
    op = _round_up(out_c, LANE)

    gb = graphs_per_step or _choose_graphs_per_step(G, np_)
    n_steps = G // gb

    # Zero-pad node/channel dims; padded A rows/cols stay zero, so padded node
    # rows never reach the real outputs (they are sliced off below).  MXU
    # operands go to bf16, biases stay f32 for the epilogue.
    a_p = _pad_axis(_pad_axis(adj, 1, np_), 2, np_).astype(jnp.bfloat16)
    x_p = _pad_axis(_pad_axis(x, 1, np_), 2, cp).astype(jnp.bfloat16)
    x_p = x_p.reshape(G * np_, cp)                 # stack graphs along sublanes
    w1 = _pad_axis(_pad_axis(params["w1"], 0, cp), 1, hp).astype(jnp.bfloat16)
    w2 = _pad_axis(_pad_axis(params["w2"], 0, hp), 1, op).astype(jnp.bfloat16)
    w3 = _pad_axis(_pad_axis(params["w3"], 0, hp), 1, op).astype(jnp.bfloat16)
    b1 = _pad_axis(params["b1"], 1, hp).astype(jnp.float32)
    b2 = _pad_axis(params["b2"], 1, op).astype(jnp.float32)
    b3 = _pad_axis(params["b3"], 1, op).astype(jnp.float32)

    shared = lambda s: pl.BlockSpec(s, lambda g: (0,) * len(s))
    embed_bytes = 2 if embed_dtype == jnp.bfloat16 else 4

    kernel = functools.partial(gcn_kernel, gb=gb, np_=np_, true_n=N)

    embed_p, gpool_p = pl.pallas_call(
        kernel,
        out_shape=(
            jax.ShapeDtypeStruct((G * np_, op), embed_dtype),
            jax.ShapeDtypeStruct((n_steps, gb, op), jnp.float32),
        ),
        grid=(n_steps,),
        in_specs=[
            pl.BlockSpec((gb, np_, np_), lambda g: (g, 0, 0)),   # A block
            pl.BlockSpec((gb * np_, cp), lambda g: (g, 0)),      # x (stacked)
            shared((cp, hp)), shared((1, hp)),                   # W1, b1
            shared((hp, op)), shared((1, op)),                   # W2, b2
            shared((hp, op)), shared((1, op)),                   # W3, b3
        ],
        out_specs=(
            pl.BlockSpec((gb * np_, op), lambda g: (g, 0)),      # embed slab
            pl.BlockSpec((1, gb, op), lambda g: (g, 0, 0)),      # pooled
        ),
        compiler_params=pltpu.CompilerParams(
            dimension_semantics=("parallel",),    # graph blocks independent
            vmem_limit_bytes=_vmem_limit_bytes(gb, np_, cp, hp, op, embed_bytes),
        ),
    )(a_p, x_p, w1, b1, w2, b2, w3, b3)

    # Slice padded lanes / nodes back out (plain-JAX glue).
    embed = embed_p.reshape(G, np_, op)[:, :N, :out_c]
    gpool = gpool_p.reshape(G, op)[:, :out_c]
    return embed, gpool


def gcn_forward(x, edge_index, edge_weight, params):
    """Single-graph forward matching the PyTorch module (batch=None)."""
    n = x.shape[0]
    adj = build_dense_adjacency(n, edge_index, edge_weight)
    embed, gpool = gcn_forward_batched(adj[None], x[None], params)
    return embed[0], gpool          # embed: [N, out], gpool: [1, out]


def gcn_reference(adj, x, params):
    """Pure-JAX f32 reference (batched)."""
    h = jnp.maximum(adj @ (x @ params["w1"]) + params["b1"], 0.0)
    embed = adj @ (h @ params["w2"]) + params["b2"]
    ge = adj @ (h @ params["w3"]) + params["b3"]
    return embed, jnp.sum(ge, axis=1)


def init_params(key, in_channels, hidden_channels, out_channels):
    """Deterministic glorot-ish init matching GCNConv parameter shapes."""
    k1, k2, k3 = jax.random.split(key, 3)

    def glorot(k, fan_in, fan_out):
        lim = jnp.sqrt(6.0 / (fan_in + fan_out))
        return jax.random.uniform(k, (fan_in, fan_out), jnp.float32, -lim, lim)

    return {
        "w1": glorot(k1, in_channels, hidden_channels),
        "b1": jnp.zeros((1, hidden_channels), jnp.float32),
        "w2": glorot(k2, hidden_channels, out_channels),
        "b2": jnp.zeros((1, out_channels), jnp.float32),
        "w3": glorot(k3, hidden_channels, out_channels),
        "b3": jnp.zeros((1, out_channels), jnp.float32),
    }


if __name__ == "__main__":
    # A small batch of synthetic graphs: G graphs, N nodes, E directed edges each.
    G, N, E = 4, 32, 64
    in_channels, hidden_channels, out_channels = 16, 32, 8

    key = jax.random.PRNGKey(0)
    kx, ke, kw, kp = jax.random.split(key, 4)

    x = jax.random.normal(kx, (G, N, in_channels), jnp.float32)
    edge_index = jax.random.randint(ke, (G, 2, E), 0, N, jnp.int32)
    edge_weight = jax.random.uniform(kw, (G, E), jnp.float32)
    params = init_params(kp, in_channels, hidden_channels, out_channels)

    # Dense adjacency build (scatter-add) stays as plain-JAX glue inside jit.
    adj = jax.vmap(functools.partial(build_dense_adjacency, N))(edge_index, edge_weight)

    # Batched forward: Gb graphs per grid step, grid kept >= 2 for megacore.
    embed, graph_embed = jax.jit(gcn_forward_batched)(adj, x, params)
    jax.block_until_ready((embed, graph_embed))
    assert embed.shape == (G, N, out_channels)
    assert graph_embed.shape == (G, out_channels)

    # Numerical sanity check against a pure-JAX f32 reference (bf16 tolerance).
    ref_embed, ref_gpool = gcn_reference(adj, x, params)
    emb_f32 = embed.astype(jnp.float32)
    gp_f32 = graph_embed.astype(jnp.float32)
    tol_e = 5e-2 * (1.0 + float(jnp.max(jnp.abs(ref_embed))))
    tol_g = 5e-2 * (1.0 + float(jnp.max(jnp.abs(ref_gpool))))
    assert float(jnp.max(jnp.abs(emb_f32 - ref_embed))) < tol_e
    assert float(jnp.max(jnp.abs(gp_f32 - ref_gpool))) < tol_g

    # Single-graph API matching the PyTorch module forward (batch=None).
    # F.dropout(p=0.5, training=False) is identity in eval mode.
    e0, g0 = jax.jit(gcn_forward)(x[0], edge_index[0], edge_weight[0], params)
    jax.block_until_ready((e0, g0))
    assert e0.shape == (N, out_channels)
    assert g0.shape == (1, out_channels)

    print("KERNEL_OK")
</pallas_src>

<mosaic_0001>
module attributes {stable_mosaic.version = 11 : i64} {
  func.func @gcn_kernel(%arg0: i32, %arg1: memref<2x128x128xbf16, #tpu.memory_space<vmem>>, %arg2: memref<256x128xbf16, #tpu.memory_space<vmem>>, %arg3: memref<128x128xbf16, #tpu.memory_space<vmem>>, %arg4: memref<1x128xf32, #tpu.memory_space<vmem>>, %arg5: memref<128x128xbf16, #tpu.memory_space<vmem>>, %arg6: memref<1x128xf32, #tpu.memory_space<vmem>>, %arg7: memref<128x128xbf16, #tpu.memory_space<vmem>>, %arg8: memref<1x128xf32, #tpu.memory_space<vmem>>, %arg9: memref<256x128xbf16, #tpu.memory_space<vmem>>, %arg10: memref<1x2x128xf32, #tpu.memory_space<vmem>>) attributes {dimension_semantics = [#tpu.dimension_semantics<parallel>], iteration_bounds = array<i64: 2>, scalar_prefetch = 0 : i64, scratch_operands = 0 : i64, tpu.core_type = #tpu.core_type<tc>, window_params = [{transform_indices = @transform_0, window_bounds = array<i64: 2, 128, 128>}, {transform_indices = @transform_1, window_bounds = array<i64: 256, 128>}, {pipeline_mode = #tpu.pipeline_mode<synchronous>, transform_indices = @transform_2, window_bounds = array<i64: 128, 128>}, {pipeline_mode = #tpu.pipeline_mode<synchronous>, transform_indices = @transform_3, window_bounds = array<i64: 1, 128>}, {pipeline_mode = #tpu.pipeline_mode<synchronous>, transform_indices = @transform_4, window_bounds = array<i64: 128, 128>}, {pipeline_mode = #tpu.pipeline_mode<synchronous>, transform_indices = @transform_5, window_bounds = array<i64: 1, 128>}, {pipeline_mode = #tpu.pipeline_mode<synchronous>, transform_indices = @transform_6, window_bounds = array<i64: 128, 128>}, {pipeline_mode = #tpu.pipeline_mode<synchronous>, transform_indices = @transform_7, window_bounds = array<i64: 1, 128>}, {transform_indices = @transform_8, window_bounds = array<i64: 256, 128>}, {transform_indices = @transform_9, window_bounds = array<i64: 1, 2, 128>}]} {
    %c0 = arith.constant 0 : index
    %c0_0 = arith.constant 0 : index
    %0 = vector.load %arg2[%c0, %c0_0] : memref<256x128xbf16, #tpu.memory_space<vmem>>, vector<256x128xbf16>
    %c0_1 = arith.constant 0 : index
    %c0_2 = arith.constant 0 : index
    %1 = vector.load %arg3[%c0_1, %c0_2] : memref<128x128xbf16, #tpu.memory_space<vmem>>, vector<128x128xbf16>
    %cst = arith.constant dense<0.000000e+00> : vector<256x128xf32>
    %2 = tpu.matmul %0, %1, %cst {dimension_numbers = #tpu.dot_dimension_numbers<[1], [0], [0], [1], [0, 0, 1, 1], [], []>} : vector<256x128xbf16>, vector<128x128xbf16>, vector<256x128xf32> -> vector<256x128xf32>
    %3 = arith.truncf %2 : vector<256x128xf32> to vector<256x128xbf16>
    %c0_3 = arith.constant 0 : index
    %c0_4 = arith.constant 0 : index
    %c0_5 = arith.constant 0 : index
    %4 = vector.load %arg1[%c0_3, %c0_4, %c0_5] : memref<2x128x128xbf16, #tpu.memory_space<vmem>>, vector<1x128x128xbf16>
    %5 = vector.shape_cast %4 : vector<1x128x128xbf16> to vector<128x128xbf16>
    %6 = vector.extract_strided_slice %3 {offsets = [0, 0], sizes = [128, 128], strides = [1, 1]} : vector<256x128xbf16> to vector<128x128xbf16>
    %cst_6 = arith.constant dense<0.000000e+00> : vector<128x128xf32>
    %7 = tpu.matmul %5, %6, %cst_6 {dimension_numbers = #tpu.dot_dimension_numbers<[1], [0], [0], [1], [0, 0, 1, 1], [], []>} : vector<128x128xbf16>, vector<128x128xbf16>, vector<128x128xf32> -> vector<128x128xf32>
    %c1 = arith.constant 1 : index
    %c0_7 = arith.constant 0 : index
    %c0_8 = arith.constant 0 : index
    %8 = vector.load %arg1[%c1, %c0_7, %c0_8] : memref<2x128x128xbf16, #tpu.memory_space<vmem>>, vector<1x128x128xbf16>
    %9 = vector.shape_cast %8 : vector<1x128x128xbf16> to vector<128x128xbf16>
    %10 = vector.extract_strided_slice %3 {offsets = [128, 0], sizes = [128, 128], strides = [1, 1]} : vector<256x128xbf16> to vector<128x128xbf16>
    %cst_9 = arith.constant dense<0.000000e+00> : vector<128x128xf32>
    %11 = tpu.matmul %9, %10, %cst_9 {dimension_numbers = #tpu.dot_dimension_numbers<[1], [0], [0], [1], [0, 0, 1, 1], [], []>} : vector<128x128xbf16>, vector<128x128xbf16>, vector<128x128xf32> -> vector<128x128xf32>
    %12 = tpu.concatenate %7, %11 in 0 : vector<128x128xf32>, vector<128x128xf32> -> vector<256x128xf32>
    %c0_10 = arith.constant 0 : index
    %c0_11 = arith.constant 0 : index
    %13 = vector.load %arg4[%c0_10, %c0_11] : memref<1x128xf32, #tpu.memory_space<vmem>>, vector<1x128xf32>
    %14 = vector.broadcast %13 : vector<1x128xf32> to vector<256x128xf32>
    %15 = arith.addf %12, %14 : vector<256x128xf32>
    %cst_12 = arith.constant 0.000000e+00 : f32
    %16 = vector.broadcast %cst_12 : f32 to vector<256x128xf32>
    %17 = arith.maximumf %15, %16 : vector<256x128xf32>
    %18 = arith.truncf %17 : vector<256x128xf32> to vector<256x128xbf16>
    %c0_13 = arith.constant 0 : index
    %c0_14 = arith.constant 0 : index
    %19 = vector.load %arg5[%c0_13, %c0_14] : memref<128x128xbf16, #tpu.memory_space<vmem>>, vector<128x128xbf16>
    %cst_15 = arith.constant dense<0.000000e+00> : vector<256x128xf32>
    %20 = tpu.matmul %18, %19, %cst_15 {dimension_numbers = #tpu.dot_dimension_numbers<[1], [0], [0], [1], [0, 0, 1, 1], [], []>} : vector<256x128xbf16>, vector<128x128xbf16>, vector<256x128xf32> -> vector<256x128xf32>
    %21 = arith.truncf %20 : vector<256x128xf32> to vector<256x128xbf16>
    %c0_16 = arith.constant 0 : index
    %c0_17 = arith.constant 0 : index
    %c0_18 = arith.constant 0 : index
    %22 = vector.load %arg1[%c0_16, %c0_17, %c0_18] : memref<2x128x128xbf16, #tpu.memory_space<vmem>>, vector<1x128x128xbf16>
    %23 = vector.shape_cast %22 : vector<1x128x128xbf16> to vector<128x128xbf16>
    %24 = vector.extract_strided_slice %21 {offsets = [0, 0], sizes = [128, 128], strides = [1, 1]} : vector<256x128xbf16> to vector<128x128xbf16>
    %cst_19 = arith.constant dense<0.000000e+00> : vector<128x128xf32>
    %25 = tpu.matmul %23, %24, %cst_19 {dimension_numbers = #tpu.dot_dimension_numbers<[1], [0], [0], [1], [0, 0, 1, 1], [], []>} : vector<128x128xbf16>, vector<128x128xbf16>, vector<128x128xf32> -> vector<128x128xf32>
    %c0_20 = arith.constant 0 : index
    %c0_21 = arith.constant 0 : index
    %26 = vector.load %arg6[%c0_20, %c0_21] : memref<1x128xf32, #tpu.memory_space<vmem>>, vector<1x128xf32>
    %27 = vector.broadcast %26 : vector<1x128xf32> to vector<128x128xf32>
    %28 = arith.addf %25, %27 : vector<128x128xf32>
    %29 = arith.truncf %28 : vector<128x128xf32> to vector<128x128xbf16>
    %c0_22 = arith.constant 0 : index
    %c0_23 = arith.constant 0 : index
    %30 = vector.load %arg9[%c0_22, %c0_23] : memref<256x128xbf16, #tpu.memory_space<vmem>>, vector<128x128xbf16>
    tpu.vector_store %arg9[%c0_22, %c0_23], %29 {strides = array<i32>} : memref<256x128xbf16, #tpu.memory_space<vmem>>, vector<128x128xbf16>,
    %31 = arith.extf %23 : vector<128x128xbf16> to vector<128x128xf32>
    %cst_24 = arith.constant dense<0.000000e+00> : vector<128xf32>
    %32 = vector.multi_reduction <add>, %31, %cst_24 [0] : vector<128x128xf32> to vector<128xf32>
    %33 = vector.shape_cast %32 : vector<128xf32> to vector<1x128xf32>
    %34 = arith.truncf %33 : vector<1x128xf32> to vector<1x128xbf16>
    %35 = vector.extract_strided_slice %18 {offsets = [0, 0], sizes = [128, 128], strides = [1, 1]} : vector<256x128xbf16> to vector<128x128xbf16>
    %cst_25 = arith.constant dense<0.000000e+00> : vector<1x128xf32>
    %36 = tpu.matmul %34, %35, %cst_25 {dimension_numbers = #tpu.dot_dimension_numbers<[1], [0], [0], [1], [0, 0, 1, 1], [], []>} : vector<1x128xbf16>, vector<128x128xbf16>, vector<1x128xf32> -> vector<1x128xf32>
    %c1_26 = arith.constant 1 : index
    %c0_27 = arith.constant 0 : index
    %c0_28 = arith.constant 0 : index
    %37 = vector.load %arg1[%c1_26, %c0_27, %c0_28] : memref<2x128x128xbf16, #tpu.memory_space<vmem>>, vector<1x128x128xbf16>
    %38 = vector.shape_cast %37 : vector<1x128x128xbf16> to vector<128x128xbf16>
    %39 = vector.extract_strided_slice %21 {offsets = [128, 0], sizes = [128, 128], strides = [1, 1]} : vector<256x128xbf16> to vector<128x128xbf16>
    %cst_29 = arith.constant dense<0.000000e+00> : vector<128x128xf32>
    %40 = tpu.matmul %38, %39, %cst_29 {dimension_numbers = #tpu.dot_dimension_numbers<[1], [0], [0], [1], [0, 0, 1, 1], [], []>} : vector<128x128xbf16>, vector<128x128xbf16>, vector<128x128xf32> -> vector<128x128xf32>
    %c0_30 = arith.constant 0 : index
    %c0_31 = arith.constant 0 : index
    %41 = vector.load %arg6[%c0_30, %c0_31] : memref<1x128xf32, #tpu.memory_space<vmem>>, vector<1x128xf32>
    %42 = vector.broadcast %41 : vector<1x128xf32> to vector<128x128xf32>
    %43 = arith.addf %40, %42 : vector<128x128xf32>
    %44 = arith.truncf %43 : vector<128x128xf32> to vector<128x128xbf16>
    %c128 = arith.constant 128 : index
    %c0_32 = arith.constant 0 : index
    %45 = vector.load %arg9[%c128, %c0_32] : memref<256x128xbf16, #tpu.memory_space<vmem>>, vector<128x128xbf16>
    tpu.vector_store %arg9[%c128, %c0_32], %44 {strides = array<i32>} : memref<256x128xbf16, #tpu.memory_space<vmem>>, vector<128x128xbf16>,
    %46 = arith.extf %38 : vector<128x128xbf16> to vector<128x128xf32>
    %cst_33 = arith.constant dense<0.000000e+00> : vector<128xf32>
    %47 = vector.multi_reduction <add>, %46, %cst_33 [0] : vector<128x128xf32> to vector<128xf32>
    %48 = vector.shape_cast %47 : vector<128xf32> to vector<1x128xf32>
    %49 = arith.truncf %48 : vector<1x128xf32> to vector<1x128xbf16>
    %50 = vector.extract_strided_slice %18 {offsets = [128, 0], sizes = [128, 128], strides = [1, 1]} : vector<256x128xbf16> to vector<128x128xbf16>
    %cst_34 = arith.constant dense<0.000000e+00> : vector<1x128xf32>
    %51 = tpu.matmul %49, %50, %cst_34 {dimension_numbers = #tpu.dot_dimension_numbers<[1], [0], [0], [1], [0, 0, 1, 1], [], []>} : vector<1x128xbf16>, vector<128x128xbf16>, vector<1x128xf32> -> vector<1x128xf32>
    %52 = tpu.concatenate %36, %51 in 0 : vector<1x128xf32>, vector<1x128xf32> -> vector<2x128xf32>
    %53 = arith.truncf %52 : vector<2x128xf32> to vector<2x128xbf16>
    %c0_35 = arith.constant 0 : index
    %c0_36 = arith.constant 0 : index
    %54 = vector.load %arg7[%c0_35, %c0_36] : memref<128x128xbf16, #tpu.memory_space<vmem>>, vector<128x128xbf16>
    %cst_37 = arith.constant dense<0.000000e+00> : vector<2x128xf32>
    %55 = tpu.matmul %53, %54, %cst_37 {dimension_numbers = #tpu.dot_dimension_numbers<[1], [0], [0], [1], [0, 0, 1, 1], [], []>} : vector<2x128xbf16>, vector<128x128xbf16>, vector<2x128xf32> -> vector<2x128xf32>
    %c0_38 = arith.constant 0 : index
    %c0_39 = arith.constant 0 : index
    %56 = vector.load %arg8[%c0_38, %c0_39] : memref<1x128xf32, #tpu.memory_space<vmem>>, vector<1x128xf32>
    %cst_40 = arith.constant 3.200000e+01 : f32
    %57 = vector.broadcast %cst_40 : f32 to vector<1x128xf32>
    %58 = arith.mulf %57, %56 : vector<1x128xf32>
    %59 = vector.broadcast %58 : vector<1x128xf32> to vector<2x128xf32>
    %60 = arith.addf %55, %59 : vector<2x128xf32>
    %c0_41 = arith.constant 0 : index
    %c0_42 = arith.constant 0 : index
    %c0_43 = arith.constant 0 : index
    %61 = vector.load %arg10[%c0_41, %c0_42, %c0_43] : memref<1x2x128xf32, #tpu.memory_space<vmem>>, vector<1x2x128xf32>
    %62 = vector.shape_cast %61 : vector<1x2x128xf32> to vector<2x128xf32>
    %63 = vector.shape_cast %60 : vector<2x128xf32> to vector<1x2x128xf32>
    tpu.vector_store %arg10[%c0_41, %c0_42, %c0_43], %63 {strides = array<i32>} : memref<1x2x128xf32, #tpu.memory_space<vmem>>, vector<1x2x128xf32>,
    return
  }
  func.func @transform_0(%arg0: i32) -> (i32, i32, i32) {
    %c0_i32 = arith.constant 0 : i32
    %c0_i32_0 = arith.constant 0 : i32
    %c0_i32_1 = arith.constant 0 : i32
    return %arg0, %c0_i32, %c0_i32_0 : i32, i32, i32
  }
  func.func @transform_1(%arg0: i32) -> (i32, i32) {
    %c0_i32 = arith.constant 0 : i32
    %c0_i32_0 = arith.constant 0 : i32
    return %arg0, %c0_i32 : i32, i32
  }
  func.func @transform_2(%arg0: i32) -> (i32, i32) {
    %c0_i32 = arith.constant 0 : i32
    %c0_i32_0 = arith.constant 0 : i32
    %c0_i32_1 = arith.constant 0 : i32
    return %c0_i32, %c0_i32_0 : i32, i32
  }
  func.func @transform_3(%arg0: i32) -> (i32, i32) {
    %c0_i32 = arith.constant 0 : i32
    %c0_i32_0 = arith.constant 0 : i32
    %c0_i32_1 = arith.constant 0 : i32
    return %c0_i32, %c0_i32_0 : i32, i32
  }
  func.func @transform_4(%arg0: i32) -> (i32, i32) {
    %c0_i32 = arith.constant 0 : i32
    %c0_i32_0 = arith.constant 0 : i32
    %c0_i32_1 = arith.constant 0 : i32
    return %c0_i32, %c0_i32_0 : i32, i32
  }
  func.func @transform_5(%arg0: i32) -> (i32, i32) {
    %c0_i32 = arith.constant 0 : i32
    %c0_i32_0 = arith.constant 0 : i32
    %c0_i32_1 = arith.constant 0 : i32
    return %c0_i32, %c0_i32_0 : i32, i32
  }
  func.func @transform_6(%arg0: i32) -> (i32, i32) {
    %c0_i32 = arith.constant 0 : i32
    %c0_i32_0 = arith.constant 0 : i32
    %c0_i32_1 = arith.constant 0 : i32
    return %c0_i32, %c0_i32_0 : i32, i32
  }
  func.func @transform_7(%arg0: i32) -> (i32, i32) {
    %c0_i32 = arith.constant 0 : i32
    %c0_i32_0 = arith.constant 0 : i32
    %c0_i32_1 = arith.constant 0 : i32
    return %c0_i32, %c0_i32_0 : i32, i32
  }
  func.func @transform_8(%arg0: i32) -> (i32, i32) {
    %c0_i32 = arith.constant 0 : i32
    %c0_i32_0 = arith.constant 0 : i32
    return %arg0, %c0_i32 : i32, i32
  }
  func.func @transform_9(%arg0: i32) -> (i32, i32, i32) {
    %c0_i32 = arith.constant 0 : i32
    %c0_i32_0 = arith.constant 0 : i32
    %c0_i32_1 = arith.constant 0 : i32
    return %arg0, %c0_i32, %c0_i32_0 : i32, i32, i32
  }
}

</mosaic_0001>

<bundles_post_ra>
// kernel: gcn_forward_batched.1
= control target key start
LH: loop header
LB: loop body
LE: loop exit
PB: predicated region body
PF: predicated region fallthrough
CT: control target
= control target key end

     0   :  { %15 = vsyncpa [#allocation3], 0  ;;  %s3188_s0 = inlined_call_operand.vmem [shape: bf16[4,128,128], index: 0, kind: input, shape index: {}]   ;;  %s3189_s1 = inlined_call_operand.vmem [shape: bf16[512,128], index: 1, kind: input, shape index: {}]   ;;  %s3190_s2 = inlined_call_operand.vmem [shape: bf16[128,128], index: 2, kind: input, shape index: {}]   ;;  %s3191_s3 = inlined_call_operand.vmem [shape: f32[1,128], index: 3, kind: input, shape index: {}]   ;;  %s3192_s4 = inlined_call_operand.vmem [shape: bf16[128,128], index: 4, kind: input, shape index: {}]   ;;  %s3193_s5 = inlined_call_operand.vmem [shape: f32[1,128], index: 5, kind: input, shape index: {}]   ;;  %s3194_s6 = inlined_call_operand.vmem [shape: bf16[128,128], index: 6, kind: input, shape index: {}]   ;;  %s3195_s7 = inlined_call_operand.vmem [shape: f32[1,128], index: 7, kind: input, shape index: {}]   ;;  %s3196_s8 = inlined_call_operand.vmem [shape: bf16[512,128], index: 8, kind: output, shape index: {0}]   ;;  %s3197_s9 = inlined_call_operand.hbm [shape: f32[2,2,128], index: 9, kind: output, shape index: {1}]  }
   0x1   :  { %17 = vsyncpa [#allocation3 + $0x1], 0  ;;  %s2651_s30 = smov 0   ;;  %s2653_s10 = smov 0  }
   0x2   :  { %s2655_s11 = smov 0   ;;  %s2657_s12 = smov 0  }
   0x3 LB: > { %s2672_s13 = sadd.s32 4294967295, %s2599_s12   ;;  %s2031_s14 = sadd.s32 4294967294, %s2599_s12   ;;  %s2599_s12 = sphi %s2657_s12, %s3203_s12   ;;  %s2595_s11 = sphi %s2655_s11, %s3202_s11   ;;  %s2591_s10 = sphi %s2653_s10, %s3201_s10   ;;  %s2587_s30 = sphi %s2651_s30, %s3200_s30  }
   0x4   : > { %s2676_s15 = sadd.s32 1, %s2599_s12   ;;  %s234_s16 = sadd.s32 1, %s2595_s11 }
   0x5   : > { %s231_s17 = ssub.s32 %s2599_s12, %s2676_s15  ;;  %p244_p0 = scmp.ne.s32.totalorder %s2595_s11, %s2591_s10 }
   0x6   : > { %p232_p1 = scmp.eq.s32.totalorder %s231_s17, 0  ;;  %p245_p2 = scmp.eq.s32.totalorder %s2672_s13, 1 }
   0x7   : > { %p250_p3 = scmp.ne.s32.totalorder %s2591_s10, %s2587_s30  ;;  %p251_p4 = scmp.eq.s32.totalorder %s2031_s14, 1 }
   0x8   : > { %s2687_s18 = scalar_select %p232_p1, %s2595_s11, %s234_s16  }
   0x9   : > { %p2689_p5 = por %p245_p2, %p244_p0  ;;  %p2693_p6 = por %p251_p4, %p250_p3 }
   0xa   : > { %p2034_p7 = scmp.ge.s32.totalorder %s2599_s12, 1  ;;  %p306_p8 = scmp.lt.s32.totalorder %s2599_s12, 3 }
   0xc   : > { %p307_p9 = pnand %p2034_p7, %p306_p8 }
   0xd   : > { %s2039_s29 = sshll.u32 (!%p307_p9), %s2672_s13, 5  ;;  %s2769_s16 = sshll.u32 (!%p307_p9), %s2672_s13, 1 }
   0xe   : > { %310 = sbr.rel (%p307_p9) target bundleno = 1158 (0x486), region = 52  ;;  %p361_p10 = scmp.lt.s32.totalorder (!%p307_p9), %s2039_s29, 63 }
   0xf   : > { %p354_p11 = scmp.lt.s32.totalorder (!%p307_p9), %s2769_s16, 3 }
  0x13   : > { %v2359_v0 = vld [vmem:[%s3190_s2 + $0x38] sm:$0xff]  ;;  %v2358_v1 = vld [vmem:[%s3190_s2 + $0x30] sm:$0xff]  ;;  %v2357_v2 = vld [vmem:[%s3190_s2 + $0x28] sm:$0xff]  ;;  %s3205_s29 = smov (!%p361_p10, %s2039_s29), 63  ;;  %vm1824_vm0 = vcmask 1040384  }
  0x14   : > { %564 = vmatpush.bf16.msra.mxu0 %v2359_v0  ;;  %v2356_v3 = vld [vmem:[%s3190_s2 + $0x20] sm:$0xff]  ;;  %v2355_v4 = vld [vmem:[%s3190_s2 + $0x18] sm:$0xff]  ;;  %v2354_v5 = vld [vmem:[%s3190_s2 + $0x10] sm:$0xff]  ;;  %s2040_s24 = sshll.u32 %s3205_s29, 2 }
  0x15   : > { %v2353_v6 = vld [vmem:[%s3190_s2 + $0x8] sm:$0xff]  ;;  %v2352_v7 = vld [vmem:[%s3190_s2] sm:$0xff]  ;;  %s2732_s14 = scalar_lea.vmem %s3189_s1, %s2040_s24  ;;  %s3098_s27 = scalar_lea.vmem %s3196_s8, %s2040_s24 }
  0x16   : > { %v2336_v8 = vld [vmem:[%s2732_s14] sm:$0xff]  ;;  %v2337_v9 = vld [vmem:[%s2732_s14 + $0x8] sm:$0xff]  ;;  %v2338_v10 = vld [vmem:[%s2732_s14 + $0x10] sm:$0xff]  ;;  %s355_s17 = scalar_select %p354_p11, %s2769_s16, 3 }
  0x17   : > { %v2339_v11 = vld [vmem:[%s2732_s14 + $0x18] sm:$0xff]  ;;  %v2340_v12 = vld [vmem:[%s2732_s14 + $0x20] sm:$0xff]  ;;  %v2341_v13 = vld [vmem:[%s2732_s14 + $0x28] sm:$0xff] }
  0x18   : > { %565 = vmatpush.bf16.msra.mxu0 %v2358_v1  ;;  %v2342_v14 = vld [vmem:[%s2732_s14 + $0x30] sm:$0xff]  ;;  %v2343_v15 = vld [vmem:[%s2732_s14 + $0x38] sm:$0xff]  ;;  %v2344_v16 = vld [vmem:[%s2732_s14 + $0x40] sm:$0xff]  ;;  %s2335_s21 = sshll.u32 %s355_s17, 6 }
  0x19   : > { %v2345_v24 = vld [vmem:[%s2732_s14 + $0x48] sm:$0xff]  ;;  %v2346_v32 = vld [vmem:[%s2732_s14 + $0x50] sm:$0xff]  ;;  %v2347_v40 = vld [vmem:[%s2732_s14 + $0x58] sm:$0xff]  ;;  %s2785_s23 = scalar_lea.vmem %s3188_s0, %s2335_s21  ;;  %s1930_s21 = scalar_lea.hbm %s3197_s9, %s2769_s16 }
  0x1a   : > { %v2348_v48 = vld [vmem:[%s2732_s14 + $0x60] sm:$0xff]  ;;  %v2349_v51 = vld [vmem:[%s2732_s14 + $0x68] sm:$0xff]  ;;  %v2350_v54 = vld [vmem:[%s2732_s14 + $0x70] sm:$0xff]  ;;  %s1934_s29 = sshll.u32 %s1930_s21, 4  ;;  %s2557_s21 = scalar_lea.hbm %s3197_s9, 4  ;;  %s1935_s29 = int_to_ptr.hbm [resolvable:$true] %s1934_s29 }
  0x1b   : > { %v2351_v57 = vld [vmem:[%s2732_s14 + $0x78] sm:$0xff]  ;;  %s2551_s24 = sshra.s32 %s1935_s29, 4  ;;  %s2552_s24 = int_to_ptr.hbm [resolvable:$true] %s2551_s24 }
  0x1c   : > { %566 = vmatpush.bf16.msra.mxu0 %v2357_v2  ;;  %s2553_s14 = scalar_lea.hbm %s2552_s24, 2  ;;  %p2558_p1 = scmp.lt.s32.totalorder %s2552_s24, %s3197_s9 }
  0x1d   : > { %p2554_p12 = scmp.ne.s32.totalorder %s2552_s24, %s2553_s14  ;;  %p2559_p2 = scmp.lt.s32.totalorder %s2557_s21, %s2553_s14 }
  0x1f   : > { %p2555_p13 = pnand %p2554_p12, %p2689_p5  ;;  %p2560_p3 = por %p2559_p2, %p2558_p1 }
  0x20   : > { %567 = vmatpush.bf16.msra.mxu0 %v2356_v3 }
  0x21   : > { %p2556_p0 = pneg %p2555_p13 }
  0x23   : > { %p2561_p4 = pnand %p2560_p3, %p2556_p0 }
  0x24   : > { %568 = vmatpush.bf16.msra.mxu0 %v2355_v4 }
  0x28   : > { %569 = vmatpush.bf16.msra.mxu0 %v2354_v5 }
  0x2c   : > { %570 = vmatpush.bf16.msra.mxu0 %v2353_v6 }
  0x30   : > { %571 = vmatpush.bf16.msra.mxu0 %v2352_v7 }
  0x33   : > { %572 = vmatmul.bf16.vlgmr.msra.gmra.mxu0 %v2336_v8 }
  0x43   : > { %577 = vmatmul.bf16.gmra.mxu0 %v2337_v9 }
  0x53   : > { %582 = vmatmul.bf16.gmra.mxu0 %v2338_v10 }
  0x63   : > { %587 = vmatmul.bf16.gmra.mxu0 %v2339_v11 }
  0x73   : > { %592 = vmatmul.bf16.gmra.mxu0 %v2340_v12 }
  0x83   : > { %597 = vmatmul.bf16.gmra.mxu0 %v2341_v13 }
  0x93   : > { %602 = vmatmul.bf16.gmra.mxu0 %v2342_v14 }
  0xa3   : > { %607 = vmatmul.bf16.gmra.mxu0 %v2343_v15 }
  0xb0   : > { %v573_v17 = vpop.f32.mrf.mxu0 }
  0xb1   : > { %v653_v18 = vpack.c.bf16 %v573_v17, %v573_v17 }
  0xb3   : > { %612 = vmatmul.bf16.gmra.mxu0 %v2344_v16  ;;  %v2743_v21 = vunpack.c.l.b16 %v653_v18 }
  0xb8   : > { %v575_v19 = vpop.f32.mrf.mxu0 }
  0xb9   : > { %v654_v20 = vpack.c.bf16 %v575_v19, %v575_v19 }
  0xbb   : > { %v2745_v22 = vunpack.c.l.b16 %v654_v20 }
  0xbd   : > { %v781_v23 = vpack.c.b16 %v2745_v22, %v2743_v21 }
  0xc0   : > { %v578_v25 = vpop.f32.mrf.mxu0 }
  0xc1   : > { %v655_v26 = vpack.c.bf16 %v578_v25, %v578_v25 }
  0xc3   : > { %617 = vmatmul.bf16.gmra.mxu0 %v2345_v24  ;;  %v2750_v29 = vunpack.c.l.b16 %v655_v26 }
  0xc8   : > { %v580_v27 = vpop.f32.mrf.mxu0 }
  0xc9   : > { %v656_v28 = vpack.c.bf16 %v580_v27, %v580_v27 }
  0xcb   : > { %v2752_v30 = vunpack.c.l.b16 %v656_v28 }
  0xcd   : > { %v782_v31 = vpack.c.b16 %v2752_v30, %v2750_v29 }
  0xd0   : > { %v583_v33 = vpop.f32.mrf.mxu0 }
  0xd1   : > { %v657_v34 = vpack.c.bf16 %v583_v33, %v583_v33  ;;  %v2788_v33 = vld [vmem:[%s2785_s23] sm:$0xff] }
  0xd3   : > { %622 = vmatmul.bf16.gmra.mxu0 %v2346_v32  ;;  %v2757_v37 = vunpack.c.l.b16 %v657_v34 }
  0xd8   : > { %v585_v35 = vpop.f32.mrf.mxu0 }
  0xd9   : > { %v658_v36 = vpack.c.bf16 %v585_v35, %v585_v35 }
  0xdb   : > { %v2759_v38 = vunpack.c.l.b16 %v658_v36 }
  0xdd   : > { %v783_v39 = vpack.c.b16 %v2759_v38, %v2757_v37  ;;  %v2801_v38 = vld [vmem:[%s2785_s23 + $0x8] sm:$0xff] }
  0xe0   : > { %v588_v41 = vpop.f32.mrf.mxu0 }
  0xe1   : > { %v659_v42 = vpack.c.bf16 %v588_v41, %v588_v41 }
  0xe3   : > { %627 = vmatmul.bf16.gmra.mxu0 %v2347_v40  ;;  %v771_v45 = vunpack.c.l.b16 %v659_v42 }
  0xe8   : > { %v590_v43 = vpop.f32.mrf.mxu0 }
  0xe9   : > { %v660_v44 = vpack.c.bf16 %v590_v43, %v590_v43  ;;  %v2811_v43 = vld [vmem:[%s2785_s23 + $0x10] sm:$0xff] }
  0xeb   : > { %v772_v46 = vunpack.c.l.b16 %v660_v44 }
  0xed   : > { %v784_v47 = vpack.c.b16 %v772_v46, %v771_v45 }
  0xf0   : > { %v593_v49 = vpop.f32.mrf.mxu0 }
  0xf1   : > { %v661_v11 = vpack.c.bf16 %v593_v49, %v593_v49  ;;  %v2815_v49 = vld [vmem:[%s2785_s23 + $0x18] sm:$0xff] }
  0xf3   : > { %632 = vmatmul.bf16.gmra.mxu0 %v2348_v48  ;;  %v773_v15 = vunpack.c.l.b16 %v661_v11 }
  0xf8   : > { %v595_v50 = vpop.f32.mrf.mxu0 }
  0xf9   : > { %v662_v8 = vpack.c.bf16 %v595_v50, %v595_v50 }
  0xfb   : > { %v774_v13 = vunpack.c.l.b16 %v662_v8  ;;  %v2379_v8 = vld [vmem:[%s3192_s4 + $0x18] sm:$0xff] }
  0xfd   : > { %v785_v19 = vpack.c.b16 %v774_v13, %v773_v15 }
 0x100   : > { %v598_v52 = vpop.f32.mrf.mxu0 }
 0x101   : > { %v663_v5 = vpack.c.bf16 %v598_v52, %v598_v52  ;;  %v2819_v52 = vld [vmem:[%s2785_s23 + $0x20] sm:$0xff] }
 0x103   : > { %637 = vmatmul.bf16.gmra.mxu0 %v2349_v51  ;;  %v775_v12 = vunpack.c.l.b16 %v663_v5 }
 0x108   : > { %v600_v53 = vpop.f32.mrf.mxu0 }
 0x109   : > { %v664_v2 = vpack.c.bf16 %v600_v53, %v600_v53 }
 0x10b   : > { %v776_v9 = vunpack.c.l.b16 %v664_v2 }
 0x10d   : > { %v786_v14 = vpack.c.b16 %v776_v9, %v775_v12 }
 0x110   : > { %v603_v55 = vpop.f32.mrf.mxu0 }
 0x111   : > { %v665_v63 = vpack.c.bf16 %v603_v55, %v603_v55  ;;  %v2823_v55 = vld [vmem:[%s2785_s23 + $0x28] sm:$0xff] }
 0x113   : > { %642 = vmatmul.bf16.gmra.mxu0 %v2350_v54  ;;  %v777_v6 = vunpack.c.l.b16 %v665_v63 }
 0x118   : > { %v605_v56 = vpop.f32.mrf.mxu0 }
 0x119   : > { %v666_v61 = vpack.c.bf16 %v605_v56, %v605_v56  ;;  %v2383_v56 = vld [vmem:[%s3192_s4 + $0x38] sm:$0xff] }
 0x11a   : > { %1268 = vmatpush.bf16.msra.mxu3 %v2383_v56 }
 0x11b   : > { %v778_v3 = vunpack.c.l.b16 %v666_v61 }
 0x11d   : > { %v787_v10 = vpack.c.b16 %v778_v3, %v777_v6 }
 0x120   : > { %v608_v58 = vpop.f32.mrf.mxu0 }
 0x121   : > { %v667_v59 = vpack.c.bf16 %v608_v58, %v608_v58  ;;  %v2382_v58 = vld [vmem:[%s3192_s4 + $0x30] sm:$0xff] }
 0x122   : > { %1269 = vmatpush.bf16.msra.mxu3 %v2382_v58 }
 0x123   : > { %647 = vmatmul.bf16.gmra.mxu0 %v2351_v57  ;;  %v779_v0 = vunpack.c.l.b16 %v667_v59  ;;  %v2381_v59 = vld [vmem:[%s3192_s4 + $0x28] sm:$0xff] }
 0x126   : > { %1270 = vmatpush.bf16.msra.mxu3 %v2381_v59 }
 0x128   : > { %v610_v60 = vpop.f32.mrf.mxu0 }
 0x129   : > { %v668_v62 = vpack.c.bf16 %v610_v60, %v610_v60 }
 0x12b   : > { %v780_v1 = vunpack.c.l.b16 %v668_v62 }
 0x12d   : > { %v788_v4 = vpack.c.b16 %v780_v1, %v779_v0  ;;  %v2380_v0 = vld [vmem:[%s3192_s4 + $0x20] sm:$0xff]  ;;  %v2839_v1 = vld [vmem:[%s2785_s23 + $0x30] sm:$0xff] }
 0x12e   : > { %1271 = vmatpush.bf16.msra.mxu3 %v2380_v0 }
 0x12f   : > { %797 = vmatpush.bf16.msra.mxu1 %v788_v4 }
 0x130   : > { %v613_v7 = vpop.f32.mrf.mxu0 }
 0x131   : > { %v669_v16 = vpack.c.bf16 %v613_v7, %v613_v7 }
 0x132   : > { %1272 = vmatpush.bf16.msra.mxu3 %v2379_v8 }
 0x133   : > { %798 = vmatpush.bf16.msra.mxu1 %v787_v10  ;;  %v2771_v20 = vunpack.c.l.b16 %v669_v16 }
 0x137   : > { %799 = vmatpush.bf16.msra.mxu1 %v786_v14  ;;  %v2378_v14 = vld [vmem:[%s3192_s4 + $0x10] sm:$0xff] }
 0x138   : > { %v615_v17 = vpop.f32.mrf.mxu0  ;;  %1273 = vmatpush.bf16.msra.mxu3 %v2378_v14 }
 0x139   : > { %v670_v18 = vpack.c.bf16 %v615_v17, %v615_v17 }
 0x13b   : > { %v2773_v24 = vunpack.c.l.b16 %v670_v18  ;;  %800 = vmatpush.bf16.msra.mxu1 %v785_v19  ;;  %v2377_v19 = vld [vmem:[%s3192_s4 + $0x8] sm:$0xff] }
 0x13c   : > { %1274 = vmatpush.bf16.msra.mxu3 %v2377_v19 }
 0x13d   : > { %v943_v25 = vpack.c.b16 %v2773_v24, %v2771_v20 }
 0x13f   : > { %801 = vmatpush.bf16.msra.mxu1 %v784_v47 }
 0x140   : > { %v618_v26 = vpop.f32.mrf.mxu0 }
 0x141   : > { %v671_v27 = vpack.c.bf16 %v618_v26, %v618_v26 }
 0x143   : > { %802 = vmatpush.bf16.msra.mxu1 %v783_v39  ;;  %v2790_v34 = vunpack.c.l.b16 %v671_v27 }
 0x147   : > { %803 = vmatpush.bf16.msra.mxu1 %v782_v31 }
 0x148   : > { %v620_v28 = vpop.f32.mrf.mxu0 }
 0x149   : > { %v672_v32 = vpack.c.bf16 %v620_v28, %v620_v28  ;;  %v2376_v28 = vld [vmem:[%s3192_s4] sm:$0xff] }
 0x14a   : > { %1275 = vmatpush.bf16.msra.mxu3 %v2376_v28 }
 0x14b   : > { %v2792_v35 = vunpack.c.l.b16 %v672_v32  ;;  %804 = vmatpush.bf16.msra.mxu1 %v781_v23  ;;  %v2855_v32 = vld [vmem:[%s2785_s23 + $0x38] sm:$0xff] }
 0x14d   : > { %v944_v29 = vpack.c.b16 %v2792_v35, %v2790_v34 }
 0x14e   : > { %805 = vmatmul.bf16.vlgmr.msra.gmra.mxu1 %v2788_v33 }
 0x150   : > { %v623_v30 = vpop.f32.mrf.mxu0 }
 0x151   : > { %v673_v31 = vpack.c.bf16 %v623_v30, %v623_v30  ;;  %v2867_v30 = vld [vmem:[%s3191_s3] ss:$0 sm:$0xff] }
 0x153   : > { %v2803_v39 = vunpack.c.l.b16 %v673_v31  ;;  %v2368_v31 = vld [vmem:[%s2785_s23 + $0x40] sm:$0xff] }
 0x158   : > { %v625_v36 = vpop.f32.mrf.mxu0 }
 0x159   : > { %v674_v37 = vpack.c.bf16 %v625_v36, %v625_v36 }
 0x15b   : > { %v2805_v40 = vunpack.c.l.b16 %v674_v37 }
 0x15d   : > { %v945_v21 = vpack.c.b16 %v2805_v40, %v2803_v39 }
 0x15e   : > { %810 = vmatmul.bf16.gmra.mxu1 %v2801_v38 }
 0x160   : > { %v628_v22 = vpop.f32.mrf.mxu0 }
 0x161   : > { %v675_v23 = vpack.c.bf16 %v628_v22, %v628_v22 }
 0x163   : > { %v933_v44 = vunpack.c.l.b16 %v675_v23 }
 0x168   : > { %v630_v41 = vpop.f32.mrf.mxu0 }
 0x169   : > { %v676_v42 = vpack.c.bf16 %v630_v41, %v630_v41  ;;  %v2369_v41 = vld [vmem:[%s2785_s23 + $0x48] sm:$0xff] }
 0x16b   : > { %v934_v45 = vunpack.c.l.b16 %v676_v42 }
 0x16d   : > { %v946_v46 = vpack.c.b16 %v934_v45, %v933_v44 }
 0x16e   : > { %815 = vmatmul.bf16.gmra.mxu1 %v2811_v43 }
 0x170   : > { %v633_v47 = vpop.f32.mrf.mxu0 }
 0x171   : > { %v677_v15 = vpack.c.bf16 %v633_v47, %v633_v47 }
 0x173   : > { %v935_v26 = vunpack.c.l.b16 %v677_v15  ;;  %v2372_v15 = vld [vmem:[%s2785_s23 + $0x60] sm:$0xff] }
 0x178   : > { %v635_v48 = vpop.f32.mrf.mxu0 }
 0x179   : > { %v678_v11 = vpack.c.bf16 %v635_v48, %v635_v48 }
 0x17b   : > { %v936_v17 = vunpack.c.l.b16 %v678_v11 }
 0x17d   : > { %v947_v27 = vpack.c.b16 %v936_v17, %v935_v26 }
 0x17e   : > { %820 = vmatmul.bf16.gmra.mxu1 %v2815_v49 }
 0x180   : > { %v638_v50 = vpop.f32.mrf.mxu0 }
 0x181   : > { %v679_v9 = vpack.c.bf16 %v638_v50, %v638_v50 }
 0x183   : > { %v937_v16 = vunpack.c.l.b16 %v679_v9 }
 0x188   : > { %v640_v51 = vpop.f32.mrf.mxu0 }
 0x189   : > { %v680_v5 = vpack.c.bf16 %v640_v51, %v640_v51 }
 0x18b   : > { %v938_v12 = vunpack.c.l.b16 %v680_v5 }
 0x18d   : > { %v948_v18 = vpack.c.b16 %v938_v12, %v937_v16 }
 0x18e   : > { %825 = vmatmul.bf16.gmra.mxu1 %v2819_v52 }
 0x190   : > { %v643_v53 = vpop.f32.mrf.mxu0 }
 0x191   : > { %v681_v2 = vpack.c.bf16 %v643_v53, %v643_v53  ;;  %v2370_v53 = vld [vmem:[%s2785_s23 + $0x50] sm:$0xff] }
 0x193   : > { %v939_v10 = vunpack.c.l.b16 %v681_v2 }
 0x198   : > { %v645_v54 = vpop.f32.mrf.mxu0 }
 0x199   : > { %v682_v62 = vpack.c.bf16 %v645_v54, %v645_v54 }
 0x19b   : > { %v940_v6 = vunpack.c.l.b16 %v682_v62 }
 0x19d   : > { %v949_v13 = vpack.c.b16 %v940_v6, %v939_v10 }
 0x19e   : > { %830 = vmatmul.bf16.gmra.mxu1 %v2823_v55 }
 0x1a0   : > { %v648_v57 = vpop.f32.mrf.mxu0 }
 0x1a1   : > { %v683_v60 = vpack.c.bf16 %v648_v57, %v648_v57 }
 0x1a3   : > { %v941_v3 = vunpack.c.l.b16 %v683_v60 }
 0x1a8   : > { %v650_v61 = vpop.f32.mrf.mxu0 }
 0x1a9   : > { %v684_v63 = vpack.c.bf16 %v650_v61, %v650_v61 }
 0x1ab   : > { %v942_v4 = vunpack.c.l.b16 %v684_v63 }
 0x1ad   : > { %v950_v7 = vpack.c.b16 %v942_v4, %v941_v3  ;;  %v2371_v3 = vld [vmem:[%s2785_s23 + $0x58] sm:$0xff] }
 0x1ae   : > { %835 = vmatmul.bf16.gmra.mxu1 %v2839_v1 }
 0x1af   : > { %959 = vmatpush.bf16.msra.mxu2 %v950_v7 }
 0x1b3   : > { %960 = vmatpush.bf16.msra.mxu2 %v949_v13 }
 0x1b7   : > { %961 = vmatpush.bf16.msra.mxu2 %v948_v18 }
 0x1bb   : > { %962 = vmatpush.bf16.msra.mxu2 %v947_v27 }
 0x1be   : > { %840 = vmatmul.bf16.gmra.mxu1 %v2855_v32 }
 0x1bf   : > { %963 = vmatpush.bf16.msra.mxu2 %v946_v46 }
 0x1c3   : > { %964 = vmatpush.bf16.msra.mxu2 %v945_v21 }
 0x1c7   : > { %965 = vmatpush.bf16.msra.mxu2 %v944_v29 }
 0x1cb   : > { %v806_v36 = vpop.f32.mrf.mxu1  ;;  %966 = vmatpush.bf16.msra.mxu2 %v943_v25 }
 0x1cc   : > { %v1012_v37 = vadd.f32 %v2867_v30, %v806_v36 }
 0x1ce   : > { %967 = vmatmul.bf16.vlgmr.msra.gmra.mxu2 %v2368_v31  ;;  %v1044_v39 = vmax.f32 %v1012_v37, 0.0 }
 0x1d0   : > { %v1076_v35 = vpack.c.bf16 %v1044_v39, %v1044_v39 }
 0x1d2   : > { %v1156_v22 = vunpack.c.l.b16 %v1076_v35 }
 0x1d3   : > { %v808_v40 = vpop.f32.mrf.mxu1 }
 0x1d4   : > { %v1013_v34 = vadd.f32 %v2867_v30, %v808_v40  ;;  %v2373_v40 = vld [vmem:[%s2785_s23 + $0x68] sm:$0xff] }
 0x1d6   : > { %v1045_v29 = vmax.f32 %v1013_v34, 0.0 }
 0x1d8   : > { %v1077_v21 = vpack.c.bf16 %v1045_v29, %v1045_v29 }
 0x1da   : > { %v1157_v23 = vunpack.c.l.b16 %v1077_v21 }
 0x1db   : > { %v811_v42 = vpop.f32.mrf.mxu1 }
 0x1dc   : > { %v2876_v44 = vpack.c.b16 %v1157_v23, %v1156_v22  ;;  %v1014_v20 = vadd.f32 %v2867_v30, %v811_v42 }
 0x1de   : > { %972 = vmatmul.bf16.gmra.mxu2 %v2369_v41  ;;  %1276 = vmatmul.bf16.vlgmr.msra.gmra.mxu3 %v2876_v44  ;;  %v1046_v24 = vmax.f32 %v1014_v20, 0.0 }
 0x1e0   : > { %v1078_v46 = vpack.c.bf16 %v1046_v24, %v1046_v24 }
 0x1e2   : > { %v1158_v50 = vunpack.c.l.b16 %v1078_v46 }
 0x1e3   : > { %v813_v25 = vpop.f32.mrf.mxu1 }
 0x1e4   : > { %v1015_v45 = vadd.f32 %v2867_v30, %v813_v25 }
 0x1e6   : > { %v1047_v47 = vmax.f32 %v1015_v45, 0.0  ;;  %v2374_v45 = vld [vmem:[%s2785_s23 + $0x70] sm:$0xff] }
 0x1e8   : > { %v1079_v48 = vpack.c.bf16 %v1047_v47, %v1047_v47 }
 0x1ea   : > { %v1159_v51 = vunpack.c.l.b16 %v1079_v48 }
 0x1eb   : > { %v816_v54 = vpop.f32.mrf.mxu1 }
 0x1ec   : > { %v2882_v56 = vpack.c.b16 %v1159_v51, %v1158_v50  ;;  %v1016_v57 = vadd.f32 %v2867_v30, %v816_v54 }
 0x1ee   : > { %977 = vmatmul.bf16.gmra.mxu2 %v2370_v53  ;;  %1281 = vmatmul.bf16.gmra.mxu3 %v2882_v56  ;;  %v1048_v58 = vmax.f32 %v1016_v57, 0.0 }
 0x1f0   : > { %v1080_v61 = vpack.c.bf16 %v1048_v58, %v1048_v58 }
 0x1f2   : > { %v1160_v0 = vunpack.c.l.b16 %v1080_v61  ;;  %v2375_v61 = vld [vmem:[%s2785_s23 + $0x78] sm:$0xff] }
 0x1f3   : > { %v818_v59 = vpop.f32.mrf.mxu1 }
 0x1f4   : > { %v1017_v60 = vadd.f32 %v2867_v30, %v818_v59 }
 0x1f6   : > { %v1049_v62 = vmax.f32 %v1017_v60, 0.0 }
 0x1f8   : > { %v1081_v63 = vpack.c.bf16 %v1049_v62, %v1049_v62 }
 0x1fa   : > { %v1161_v2 = vunpack.c.l.b16 %v1081_v63 }
 0x1fb   : > { %v821_v4 = vpop.f32.mrf.mxu1 }
 0x1fc   : > { %v2888_v5 = vpack.c.b16 %v1161_v2, %v1160_v0  ;;  %v1018_v6 = vadd.f32 %v2867_v30, %v821_v4 }
 0x1fe   : > { %982 = vmatmul.bf16.gmra.mxu2 %v2371_v3  ;;  %1286 = vmatmul.bf16.gmra.mxu3 %v2888_v5  ;;  %v1050_v7 = vmax.f32 %v1018_v6, 0.0 }
 0x200   : > { %v1082_v10 = vpack.c.bf16 %v1050_v7, %v1050_v7 }
 0x202   : > { %v1162_v13 = vunpack.c.l.b16 %v1082_v10 }
 0x203   : > { %v823_v8 = vpop.f32.mrf.mxu1 }
 0x204   : > { %v1019_v9 = vadd.f32 %v2867_v30, %v823_v8 }
 0x206   : > { %v1051_v11 = vmax.f32 %v1019_v9, 0.0 }
 0x208   : > { %v1083_v12 = vpack.c.bf16 %v1051_v11, %v1051_v11 }
 0x20a   : > { %v1163_v14 = vunpack.c.l.b16 %v1083_v12 }
 0x20b   : > { %v826_v16 = vpop.f32.mrf.mxu1 }
 0x20c   : > { %v2894_v17 = vpack.c.b16 %v1163_v14, %v1162_v13  ;;  %v1020_v18 = vadd.f32 %v2867_v30, %v826_v16 }
 0x20e   : > { %987 = vmatmul.bf16.gmra.mxu2 %v2372_v15  ;;  %1291 = vmatmul.bf16.gmra.mxu3 %v2894_v17  ;;  %v1052_v19 = vmax.f32 %v1020_v18, 0.0 }
 0x210   : > { %v1084_v28 = vpack.c.bf16 %v1052_v19, %v1052_v19 }
 0x212   : > { %v1164_v37 = vunpack.c.l.b16 %v1084_v28 }
 0x213   : > { %v828_v26 = vpop.f32.mrf.mxu1 }
 0x214   : > { %v1021_v27 = vadd.f32 %v2867_v30, %v828_v26 }
 0x216   : > { %v1053_v31 = vmax.f32 %v1021_v27, 0.0 }
 0x218   : > { %v1085_v36 = vpack.c.bf16 %v1053_v31, %v1053_v31 }
 0x21a   : > { %v1165_v39 = vunpack.c.l.b16 %v1085_v36 }
 0x21b   : > { %v831_v34 = vpop.f32.mrf.mxu1 }
 0x21c   : > { %v1192_v35 = vpack.c.b16 %v1165_v39, %v1164_v37  ;;  %v1022_v29 = vadd.f32 %v2867_v30, %v831_v34 }
 0x21e   : > { %992 = vmatmul.bf16.gmra.mxu2 %v2373_v40  ;;  %1296 = vmatmul.bf16.gmra.mxu3 %v1192_v35  ;;  %v1054_v21 = vmax.f32 %v1022_v29, 0.0 }
 0x220   : > { %v1086_v41 = vpack.c.bf16 %v1054_v21, %v1054_v21 }
 0x222   : > { %v1166_v24 = vunpack.c.l.b16 %v1086_v41 }
 0x223   : > { %v833_v22 = vpop.f32.mrf.mxu1 }
 0x224   : > { %v1023_v23 = vadd.f32 %v2867_v30, %v833_v22 }
 0x226   : > { %v1055_v42 = vmax.f32 %v1023_v23, 0.0 }
 0x228   : > { %v1087_v20 = vpack.c.bf16 %v1055_v42, %v1055_v42 }
 0x22a   : > { %v1167_v25 = vunpack.c.l.b16 %v1087_v20 }
 0x22b   : > { %v836_v46 = vpop.f32.mrf.mxu1 }
 0x22c   : > { %v1193_v47 = vpack.c.b16 %v1167_v25, %v1166_v24  ;;  %v1024_v48 = vadd.f32 %v2867_v30, %v836_v46 }
 0x22e   : > { %997 = vmatmul.bf16.gmra.mxu2 %v2374_v45  ;;  %1301 = vmatmul.bf16.gmra.mxu3 %v1193_v47  ;;  %v1056_v50 = vmax.f32 %v1024_v48, 0.0 }
 0x230   : > { %v1088_v54 = vpack.c.bf16 %v1056_v50, %v1056_v50 }
 0x232   : > { %v1168_v59 = vunpack.c.l.b16 %v1088_v54 }
 0x233   : > { %v838_v51 = vpop.f32.mrf.mxu1 }
 0x234   : > { %v1025_v53 = vadd.f32 %v2867_v30, %v838_v51 }
 0x236   : > { %v1057_v57 = vmax.f32 %v1025_v53, 0.0 }
 0x238   : > { %v1089_v58 = vpack.c.bf16 %v1057_v57, %v1057_v57 }
 0x23a   : > { %v1169_v60 = vunpack.c.l.b16 %v1089_v58 }
 0x23b   : > { %v841_v62 = vpop.f32.mrf.mxu1 }
 0x23c   : > { %v1194_v63 = vpack.c.b16 %v1169_v60, %v1168_v59  ;;  %v1026_v0 = vadd.f32 %v2867_v30, %v841_v62 }
 0x23e   : > { %1002 = vmatmul.bf16.gmra.mxu2 %v2375_v61  ;;  %1306 = vmatmul.bf16.gmra.mxu3 %v1194_v63  ;;  %v1058_v2 = vmax.f32 %v1026_v0, 0.0 }
 0x240   : > { %v1090_v6 = vpack.c.bf16 %v1058_v2, %v1058_v2 }
 0x242   : > { %v1170_v9 = vunpack.c.l.b16 %v1090_v6 }
 0x243   : > { %v843_v3 = vpop.f32.mrf.mxu1 }
 0x244   : > { %v1027_v4 = vadd.f32 %v2867_v30, %v843_v3 }
 0x246   : > { %v1059_v7 = vmax.f32 %v1027_v4, 0.0 }
 0x248   : > { %v1091_v8 = vpack.c.bf16 %v1059_v7, %v1059_v7 }
 0x24a   : > { %v1171_v10 = vunpack.c.l.b16 %v1091_v8 }
 0x24c   : > { %v1195_v11 = vpack.c.b16 %v1171_v10, %v1170_v9 }
 0x24e   : > { %1311 = vmatmul.bf16.gmra.mxu3 %v1195_v11 }
 0x24f   : > { %1560 = vmatpush.bf16.msrb.mxu3 %v1195_v11 }
 0x251   : > { %v968_v12 = vpop.f32.mrf.mxu2 }
 0x252   : > { %v1028_v13 = vadd.f32 %v2867_v30, %v968_v12 }
 0x253   : > { %1561 = vmatpush.bf16.msrb.mxu3 %v1194_v63 }
 0x254   : > { %v1060_v14 = vmax.f32 %v1028_v13, 0.0 }
 0x256   : > { %v1092_v18 = vpack.c.bf16 %v1060_v14, %v1060_v14 }
 0x257   : > { %1562 = vmatpush.bf16.msrb.mxu3 %v1193_v47 }
 0x258   : > { %v1172_v27 = vunpack.c.l.b16 %v1092_v18 }
 0x259   : > { %v970_v15 = vpop.f32.mrf.mxu2 }
 0x25a   : > { %v1029_v16 = vadd.f32 %v2867_v30, %v970_v15 }
 0x25b   : > { %1563 = vmatpush.bf16.msrb.mxu3 %v1192_v35 }
 0x25c   : > { %v1061_v19 = vmax.f32 %v1029_v16, 0.0 }
 0x25e   : > { %v1093_v26 = vpack.c.bf16 %v1061_v19, %v1061_v19 }
 0x25f   : > { %1564 = vmatpush.bf16.msrb.mxu3 %v2894_v17 }
 0x260   : > { %v1173_v28 = vunpack.c.l.b16 %v1093_v26 }
 0x261   : > { %v973_v31 = vpop.f32.mrf.mxu2  ;;  %v1277_v36 = vpop.f32.mrf.mxu3 }
 0x262   : > { %v2911_v37 = vpack.c.b16 %v1173_v28, %v1172_v27  ;;  %v1030_v39 = vadd.f32 %v2867_v30, %v973_v31  ;;  %v1357_v34 = vpack.c.bf16 %v1277_v36, %v1277_v36 }
 0x263   : > { %1565 = vmatpush.bf16.msrb.mxu3 %v2888_v5 }
 0x264   : > { %1316 = vmatmul.bf16.gmra.mxu3 %v2911_v37  ;;  %v1062_v40 = vmax.f32 %v1030_v39, 0.0  ;;  %v2919_v23 = vunpack.c.l.b16 %v1357_v34 }
 0x266   : > { %v1094_v22 = vpack.c.bf16 %v1062_v40, %v1062_v40 }
 0x267   : > { %1566 = vmatpush.bf16.msrb.mxu3 %v2882_v56 }
 0x268   : > { %v1174_v56 = vunpack.c.l.b16 %v1094_v22 }
 0x269   : > { %v975_v35 = vpop.f32.mrf.mxu2  ;;  %v1279_v29 = vpop.f32.mrf.mxu3 }
 0x26a   : > { %v1031_v17 = vadd.f32 %v2867_v30, %v975_v35  ;;  %v1358_v21 = vpack.c.bf16 %v1279_v29, %v1279_v29 }
 0x26b   : > { %1567 = vmatpush.bf16.msrb.mxu3 %v2876_v44 }
 0x26c   : > { %v1063_v41 = vmax.f32 %v1031_v17, 0.0  ;;  %v2921_v5 = vunpack.c.l.b16 %v1358_v21 }
 0x26e   : > { %v1095_v42 = vpack.c.bf16 %v1063_v41, %v1063_v41  ;;  %v1425_v20 = vpack.c.b16 %v2921_v5, %v2919_v23 }
 0x270   : > { %v1175_v24 = vunpack.c.l.b16 %v1095_v42 }
 0x271   : > { %v978_v25 = vpop.f32.mrf.mxu2  ;;  %v1282_v45 = vpop.f32.mrf.mxu3 }
 0x272   : > { %v2925_v46 = vpack.c.b16 %v1175_v24, %v1174_v56  ;;  %v1032_v47 = vadd.f32 %v2867_v30, %v978_v25  ;;  %v1359_v48 = vpack.c.bf16 %v1282_v45, %v1282_v45 }
 0x274   : > { %1321 = vmatmul.bf16.gmra.mxu3 %v2925_v46  ;;  %v1064_v44 = vmax.f32 %v1032_v47, 0.0  ;;  %v2930_v58 = vunpack.c.l.b16 %v1359_v48 }
 0x276   : > { %v1096_v57 = vpack.c.bf16 %v1064_v44, %v1064_v44 }
 0x278   : > { %v1176_v63 = vunpack.c.l.b16 %v1096_v57 }
 0x279   : > { %v980_v50 = vpop.f32.mrf.mxu2  ;;  %v1284_v51 = vpop.f32.mrf.mxu3 }
 0x27a   : > { %v1033_v53 = vadd.f32 %v2867_v30, %v980_v50  ;;  %v1360_v54 = vpack.c.bf16 %v1284_v51, %v1284_v51 }
 0x27c   : > { %v1065_v59 = vmax.f32 %v1033_v53, 0.0  ;;  %v2932_v60 = vunpack.c.l.b16 %v1360_v54 }
 0x27e   : > { %v1097_v61 = vpack.c.bf16 %v1065_v59, %v1065_v59  ;;  %v1426_v62 = vpack.c.b16 %v2932_v60, %v2930_v58 }
 0x280   : > { %v1177_v0 = vunpack.c.l.b16 %v1097_v61 }
 0x281   : > { %v983_v2 = vpop.f32.mrf.mxu2  ;;  %v1287_v3 = vpop.f32.mrf.mxu3 }
 0x282   : > { %v2936_v4 = vpack.c.b16 %v1177_v0, %v1176_v63  ;;  %v1034_v6 = vadd.f32 %v2867_v30, %v983_v2  ;;  %v1361_v8 = vpack.c.bf16 %v1287_v3, %v1287_v3 }
 0x284   : > { %1326 = vmatmul.bf16.gmra.mxu3 %v2936_v4  ;;  %v1066_v7 = vmax.f32 %v1034_v6, 0.0  ;;  %v2941_v14 = vunpack.c.l.b16 %v1361_v8 }
 0x286   : > { %v1098_v13 = vpack.c.bf16 %v1066_v7, %v1066_v7 }
 0x288   : > { %v1178_v26 = vunpack.c.l.b16 %v1098_v13 }
 0x289   : > { %v985_v9 = vpop.f32.mrf.mxu2  ;;  %v1289_v10 = vpop.f32.mrf.mxu3 }
 0x28a   : > { %v1035_v11 = vadd.f32 %v2867_v30, %v985_v9  ;;  %v1362_v12 = vpack.c.bf16 %v1289_v10, %v1289_v10 }
 0x28c   : > { %v1067_v15 = vmax.f32 %v1035_v11, 0.0  ;;  %v2943_v16 = vunpack.c.l.b16 %v1362_v12 }
 0x28e   : > { %v1099_v18 = vpack.c.bf16 %v1067_v15, %v1067_v15  ;;  %v1427_v19 = vpack.c.b16 %v2943_v16, %v2941_v14 }
 0x290   : > { %v1179_v27 = vunpack.c.l.b16 %v1099_v18 }
 0x291   : > { %v988_v28 = vpop.f32.mrf.mxu2  ;;  %v1292_v31 = vpop.f32.mrf.mxu3 }
 0x292   : > { %v2947_v36 = vpack.c.b16 %v1179_v27, %v1178_v26  ;;  %v1036_v39 = vadd.f32 %v2867_v30, %v988_v28  ;;  %v1363_v34 = vpack.c.bf16 %v1292_v31, %v1292_v31 }
 0x294   : > { %1331 = vmatmul.bf16.gmra.mxu3 %v2947_v36  ;;  %v1068_v40 = vmax.f32 %v1036_v39, 0.0  ;;  %v2952_v41 = vunpack.c.l.b16 %v1363_v34 }
 0x296   : > { %v1100_v22 = vpack.c.bf16 %v1068_v40, %v1068_v40 }
 0x298   : > { %v1180_v45 = vunpack.c.l.b16 %v1100_v22 }
 0x299   : > { %v990_v35 = vpop.f32.mrf.mxu2  ;;  %v1294_v29 = vpop.f32.mrf.mxu3 }
 0x29a   : > { %v1037_v17 = vadd.f32 %v2867_v30, %v990_v35  ;;  %v1364_v21 = vpack.c.bf16 %v1294_v29, %v1294_v29 }
 0x29c   : > { %v1069_v42 = vmax.f32 %v1037_v17, 0.0  ;;  %v2954_v56 = vunpack.c.l.b16 %v1364_v21 }
 0x29e   : > { %v1101_v24 = vpack.c.bf16 %v1069_v42, %v1069_v42  ;;  %v1428_v25 = vpack.c.b16 %v2954_v56, %v2952_v41 }
 0x2a0   : > { %v1181_v47 = vunpack.c.l.b16 %v1101_v24 }
 0x2a1   : > { %v993_v44 = vpop.f32.mrf.mxu2  ;;  %v2958_v48 = vpop.f32.mrf.mxu3 }
 0x2a2   : > { %v1200_v50 = vpack.c.b16 %v1181_v47, %v1180_v45  ;;  %v1038_v51 = vadd.f32 %v2867_v30, %v993_v44 }
 0x2a4   : > { %1336 = vmatmul.bf16.gmra.mxu3 %v1200_v50  ;;  %v1070_v53 = vmax.f32 %v1038_v51, 0.0 }
 0x2a6   : > { %v1102_v61 = vpack.c.bf16 %v1070_v53, %v1070_v53 }
 0x2a8   : > { %v1182_v2 = vunpack.c.l.b16 %v1102_v61 }
 0x2a9   : > { %v995_v54 = vpop.f32.mrf.mxu2  ;;  %v1299_v57 = vpop.f32.mrf.mxu3 }
 0x2aa   : > { %v1039_v59 = vadd.f32 %v2867_v30, %v995_v54 }
 0x2ac   : > { %v1071_v63 = vmax.f32 %v1039_v59, 0.0 }
 0x2ae   : > { %v1103_v0 = vpack.c.bf16 %v1071_v63, %v1071_v63 }
 0x2b0   : > { %v1183_v3 = vunpack.c.l.b16 %v1103_v0 }
 0x2b1   : > { %v998_v6 = vpop.f32.mrf.mxu2  ;;  %v1302_v7 = vpop.f32.mrf.mxu3 }
 0x2b2   : > { %v1201_v8 = vpack.c.b16 %v1183_v3, %v1182_v2  ;;  %v1040_v9 = vadd.f32 %v2867_v30, %v998_v6 }
 0x2b4   : > { %1341 = vmatmul.bf16.gmra.mxu3 %v1201_v8  ;;  %v1072_v10 = vmax.f32 %v1040_v9, 0.0  ;;  %v1367_v9 = vpack.c.bf16 %v1302_v7, %v1302_v7 }
 0x2b6   : > { %v1104_v15 = vpack.c.bf16 %v1072_v10, %v1072_v10 }
 0x2b8   : > { %v1184_v27 = vunpack.c.l.b16 %v1104_v15 }
 0x2b9   : > { %v1000_v11 = vpop.f32.mrf.mxu2  ;;  %v1304_v12 = vpop.f32.mrf.mxu3 }
 0x2ba   : > { %v1041_v13 = vadd.f32 %v2867_v30, %v1000_v11  ;;  %v1368_v3 = vpack.c.bf16 %v1304_v12, %v1304_v12  ;;  %v1366_v11 = vpack.c.bf16 %v1299_v57, %v1299_v57 }
 0x2bc   : > { %v1073_v18 = vmax.f32 %v1041_v13, 0.0  ;;  %v1420_v13 = vunpack.c.l.b16 %v1368_v3 }
 0x2be   : > { %v1105_v26 = vpack.c.bf16 %v1073_v18, %v1073_v18  ;;  %v1365_v18 = vpack.c.bf16 %v2958_v48, %v2958_v48 }
 0x2c0   : > { %v1185_v28 = vunpack.c.l.b16 %v1105_v26  ;;  %v1419_v26 = vunpack.c.l.b16 %v1367_v9  ;;  %v1417_v12 = vunpack.c.l.b16 %v1365_v18 }
 0x2c1   : > { %v1003_v31 = vpop.f32.mrf.mxu2  ;;  %v1307_v39 = vpop.f32.mrf.mxu3 }
 0x2c2   : > { %v1202_v40 = vpack.c.b16 %v1185_v28, %v1184_v27  ;;  %v1042_v34 = vadd.f32 %v2867_v30, %v1003_v31  ;;  %v1369_v63 = vpack.c.bf16 %v1307_v39, %v1307_v39  ;;  %v1418_v27 = vunpack.c.l.b16 %v1366_v11  ;;  %v2255_v11 = vld [vmem:[%s2785_s23 + $0x50] sm:$0xff]  }
 0x2c3   : > { %v1430_v28 = vpack.c.b16 %v1420_v13, %v1419_v26  ;;  %v1774_v26 = vunpack.c.l.bf16 %v2255_v11 }
 0x2c4   : > { %1346 = vmatmul.bf16.gmra.mxu3 %v1202_v40  ;;  %v1074_v35 = vmax.f32 %v1042_v34, 0.0  ;;  %v1421_v10 = vunpack.c.l.b16 %v1369_v63  ;;  %v1429_v7 = vpack.c.b16 %v1418_v27, %v1417_v12 }
 0x2c6   : > { %v1106_v22 = vpack.c.bf16 %v1074_v35, %v1074_v35 }
 0x2c8   : > { %v1186_v45 = vunpack.c.l.b16 %v1106_v22 }
 0x2c9   : > { %v1005_v29 = vpop.f32.mrf.mxu2  ;;  %v1309_v17 = vpop.f32.mrf.mxu3 }
 0x2ca   : > { %v1043_v21 = vadd.f32 %v2867_v30, %v1005_v29  ;;  %v1370_v59 = vpack.c.bf16 %v1309_v17, %v1309_v17  ;;  %v685_v29 = vld [vmem:[%s2785_s23] sm:$0xff]  }
 0x2cb   : > { %v1523_v22 = vunpack.c.h.bf16 %v685_v29 }
 0x2cc   : > { %v1075_v42 = vmax.f32 %v1043_v21, 0.0  ;;  %v1422_v30 = vunpack.c.l.b16 %v1370_v59  ;;  %v1522_v21 = vunpack.c.l.bf16 %v685_v29  ;;  %v2253_v59 = vld [vmem:[%s2785_s23 + $0x48] sm:$0xff]  }
 0x2cd   : > { %v1773_v9 = vunpack.c.h.bf16 %v2253_v59 }
 0x2ce   : > { %v1107_v24 = vpack.c.bf16 %v1075_v42, %v1075_v42  ;;  %v1431_v15 = vpack.c.b16 %v1422_v30, %v1421_v10  ;;  %v687_v42 = vld [vmem:[%s2785_s23 + $0x8] sm:$0xff]   ;;  %v691_v10 = vld [vmem:[%s2785_s23 + $0x18] sm:$0xff]  }
 0x2d0   : > { %v1187_v47 = vunpack.c.l.b16 %v1107_v24  ;;  %v1524_v24 = vunpack.c.l.bf16 %v687_v42 }
 0x2d1   : > { %v1312_v44 = vpop.f32.mrf.mxu3 }
 0x2d2   : > { %v1203_v51 = vpack.c.b16 %v1187_v47, %v1186_v45  ;;  %v1371_v53 = vpack.c.bf16 %v1312_v44, %v1312_v44  ;;  %v1538_v45 = vadd.f32 %v1523_v22, %v1522_v21  ;;  %v1525_v44 = vunpack.c.h.bf16 %v687_v42 }
 0x2d4   : > { %1351 = vmatmul.bf16.gmra.mxu3 %v1203_v51  ;;  %1808 = vmatpush.bf16.msrb.mxu0 %v1203_v51  ;;  %v1423_v0 = vunpack.c.l.b16 %v1371_v53  ;;  %v1539_v51 = vadd.f32 %v1538_v45, %v1524_v24  ;;  %v697_v45 = vld [vmem:[%s2785_s23 + $0x30] sm:$0xff]  }
 0x2d8   : > { %1809 = vmatpush.bf16.msrb.mxu0 %v1202_v40 }
 0x2d9   : > { %v1314_v54 = vpop.f32.mrf.mxu3 }
 0x2da   : > { %v1372_v61 = vpack.c.bf16 %v1314_v54, %v1314_v54  ;;  %v689_v54 = vld [vmem:[%s2785_s23 + $0x10] sm:$0xff]  }
 0x2db   : > { %v1526_v63 = vunpack.c.l.bf16 %v689_v54  ;;  %v1527_v30 = vunpack.c.h.bf16 %v689_v54 }
 0x2dc   : > { %v1424_v2 = vunpack.c.l.b16 %v1372_v61  ;;  %1810 = vmatpush.bf16.msrb.mxu0 %v1201_v8 }
 0x2de   : > { %v1432_v6 = vpack.c.b16 %v1424_v2, %v1423_v0  ;;  %v1540_v0 = vadd.f32 %v1539_v51, %v1525_v44  ;;  %v1772_v2 = vunpack.c.l.bf16 %v2253_v59  ;;  %v1534_v51 = vunpack.c.l.bf16 %v697_v45 }
 0x2e0   : > { %1441 = vmatpush.bf16.msrb.mxu1 %v1432_v6  ;;  %1811 = vmatpush.bf16.msrb.mxu0 %v1200_v50  ;;  %v1541_v6 = vadd.f32 %v1540_v0, %v1526_v63 }
 0x2e2   : > { %v1542_v18 = vadd.f32 %v1541_v6, %v1527_v30 }
 0x2e4   : > { %1442 = vmatpush.bf16.msrb.mxu1 %v1431_v15  ;;  %1812 = vmatpush.bf16.msrb.mxu0 %v2947_v36  ;;  %v1528_v15 = vunpack.c.l.bf16 %v691_v10 }
 0x2e6   : > { %v1543_v12 = vadd.f32 %v1542_v18, %v1528_v15 }
 0x2e7   : > { %v1317_v8 = vpop.f32.mrf.mxu3 }
 0x2e8   : > { %1443 = vmatpush.bf16.msrb.mxu1 %v1430_v28  ;;  %1813 = vmatpush.bf16.msrb.mxu0 %v2936_v4  ;;  %v1373_v50 = vpack.c.bf16 %v1317_v8, %v1317_v8  ;;  %v1529_v8 = vunpack.c.h.bf16 %v691_v10 }
 0x2ea   : > { %v2975_v36 = vunpack.c.l.b16 %v1373_v50  ;;  %v693_v50 = vld [vmem:[%s2785_s23 + $0x20] sm:$0xff]  }
 0x2ec   : > { %1444 = vmatpush.bf16.msrb.mxu1 %v1429_v7  ;;  %1814 = vmatpush.bf16.msrb.mxu0 %v2925_v46  ;;  %v1775_v7 = vunpack.c.h.bf16 %v2255_v11 }
 0x2ef   : > { %v1319_v57 = vpop.f32.mrf.mxu3 }
 0x2f0   : > { %v1374_v31 = vpack.c.bf16 %v1319_v57, %v1319_v57  ;;  %1445 = vmatpush.bf16.msrb.mxu1 %v1428_v25  ;;  %1815 = vmatpush.bf16.msrb.mxu0 %v2911_v37  ;;  %v2257_v57 = vld [vmem:[%s2785_s23 + $0x58] sm:$0xff]  }
 0x2f2   : > { %v2977_v48 = vunpack.c.l.b16 %v1374_v31 }
 0x2f4   : > { %1446 = vmatpush.bf16.msrb.mxu1 %v1427_v19  ;;  %v1673_v46 = vpack.c.b16 %v2977_v48, %v2975_v36  ;;  %v2395_v36 = vld [vmem:[%s3194_s6 + $0x18] sm:$0xff] }
 0x2f5   : > { %v2387_v48 = vld [vmem:[%s2785_s23 + $0x58] sm:$0xff] }
 0x2f7   : > { %v1322_v4 = vpop.f32.mrf.mxu3 }
 0x2f8   : > { %1447 = vmatpush.bf16.msrb.mxu1 %v1426_v62  ;;  %v1375_v37 = vpack.c.bf16 %v1322_v4, %v1322_v4  ;;  %v1530_v4 = vunpack.c.l.bf16 %v693_v50 }
 0x2fa   : > { %v2991_v25 = vunpack.c.l.b16 %v1375_v37  ;;  %v1544_v37 = vadd.f32 %v1543_v12, %v1529_v8 }
 0x2fc   : > { %1448 = vmatpush.bf16.msrb.mxu1 %v1425_v20 }
 0x2ff   : > { %v1324_v41 = vpop.f32.mrf.mxu3  ;;  %1449 = vmatmul.bf16.vlgmr.msrb.gmra.mxu1 %v2788_v33 }
 0x300   : > { %v1376_v56 = vpack.c.bf16 %v1324_v41, %v1324_v41  ;;  %v1776_v41 = vunpack.c.l.bf16 %v2257_v57 }
 0x302   : > { %v2993_v14 = vunpack.c.l.b16 %v1376_v56 }
 0x304   : > { %v1674_v16 = vpack.c.b16 %v2993_v14, %v2991_v25  ;;  %v2396_v25 = vld [vmem:[%s3194_s6 + $0x20] sm:$0xff]  ;;  %v2386_v14 = vld [vmem:[%s2785_s23 + $0x50] sm:$0xff] }
 0x307   : > { %v1327_v19 = vpop.f32.mrf.mxu3 }
 0x308   : > { %v1377_v58 = vpack.c.bf16 %v1327_v19, %v1327_v19  ;;  %v1531_v19 = vunpack.c.h.bf16 %v693_v50 }
 0x30a   : > { %v2998_v5 = vunpack.c.l.b16 %v1377_v58  ;;  %v1545_v58 = vadd.f32 %v1544_v37, %v1530_v4 }
 0x30f   : > { %v1329_v60 = vpop.f32.mrf.mxu3  ;;  %1454 = vmatmul.bf16.gmra.mxu1 %v2801_v38 }
 0x310   : > { %v1378_v23 = vpack.c.bf16 %v1329_v60, %v1329_v60  ;;  %v1777_v60 = vunpack.c.h.bf16 %v2257_v57 }
 0x312   : > { %v3000_v20 = vunpack.c.l.b16 %v1378_v23  ;;  %v695_v23 = vld [vmem:[%s2785_s23 + $0x28] sm:$0xff]  }
 0x313   : > { %v1533_v22 = vunpack.c.h.bf16 %v695_v23 }
 0x314   : > { %v1675_v33 = vpack.c.b16 %v3000_v20, %v2998_v5  ;;  %v2393_v5 = vld [vmem:[%s3194_s6 + $0x8] sm:$0xff] }
 0x315   : > { %v2389_v20 = vld [vmem:[%s2785_s23 + $0x68] sm:$0xff] }
 0x317   : > { %v1332_v62 = vpop.f32.mrf.mxu3 }
 0x318   : > { %v1379_v39 = vpack.c.bf16 %v1332_v62, %v1332_v62  ;;  %v2259_v62 = vld [vmem:[%s2785_s23 + $0x60] sm:$0xff]  }
 0x319   : > { %v1779_v24 = vunpack.c.h.bf16 %v2259_v62 }
 0x31a   : > { %v3005_v35 = vunpack.c.l.b16 %v1379_v39 }
 0x31f   : > { %v1334_v40 = vpop.f32.mrf.mxu3  ;;  %1459 = vmatmul.bf16.gmra.mxu1 %v2811_v43  ;;  %v2251_v43 = vld [vmem:[%s2785_s23 + $0x40] sm:$0xff]  }
 0x320   : > { %v1380_v34 = vpack.c.bf16 %v1334_v40, %v1334_v40  ;;  %v1770_v53 = vunpack.c.l.bf16 %v2251_v43  ;;  %v1771_v61 = vunpack.c.h.bf16 %v2251_v43  ;;  %v1532_v40 = vunpack.c.l.bf16 %v695_v23  ;;  %v2261_v43 = vld [vmem:[%s2785_s23 + $0x68] sm:$0xff]  }
 0x321   : > { %v1780_v54 = vunpack.c.l.bf16 %v2261_v43  ;;  %v1781_v0 = vunpack.c.h.bf16 %v2261_v43 }
 0x322   : > { %v3007_v38 = vunpack.c.l.b16 %v1380_v34  ;;  %v1786_v3 = vadd.f32 %v1771_v61, %v1770_v53  ;;  %v1778_v34 = vunpack.c.l.bf16 %v2259_v62  ;;  %v1535_v61 = vunpack.c.h.bf16 %v697_v45 }
 0x324   : > { %v1676_v17 = vpack.c.b16 %v3007_v38, %v3005_v35  ;;  %v1787_v13 = vadd.f32 %v1786_v3, %v1772_v2  ;;  %v699_v2 = vld [vmem:[%s2785_s23 + $0x38] sm:$0xff]   ;;  %v2263_v3 = vld [vmem:[%s2785_s23 + $0x70] sm:$0xff]   ;;  %v2397_v35 = vld [vmem:[%s3194_s6 + $0x28] sm:$0xff] }
 0x325   : > { %v1536_v6 = vunpack.c.l.bf16 %v699_v2  ;;  %v1782_v10 = vunpack.c.l.bf16 %v2263_v3  ;;  %v1537_v15 = vunpack.c.h.bf16 %v699_v2  ;;  %v2385_v38 = vld [vmem:[%s2785_s23 + $0x48] sm:$0xff] }
 0x326   : > { %v1788_v28 = vadd.f32 %v1787_v13, %v1773_v9 }
 0x327   : > { %v3013_v47 = vpop.f32.mrf.mxu3 }
 0x328   : > { %v1789_v31 = vadd.f32 %v1788_v28, %v1774_v26  ;;  %v1783_v26 = vunpack.c.h.bf16 %v2263_v3  ;;  %v2265_v28 = vld [vmem:[%s2785_s23 + $0x78] sm:$0xff]  }
 0x32a   : > { %v1790_v56 = vadd.f32 %v1789_v31, %v1775_v7  ;;  %v1784_v7 = vunpack.c.l.bf16 %v2265_v28  ;;  %v1785_v31 = vunpack.c.h.bf16 %v2265_v28 }
 0x32c   : > { %v1791_v39 = vadd.f32 %v1790_v56, %v1776_v41 }
 0x32e   : > { %v1792_v21 = vadd.f32 %v1791_v39, %v1777_v60 }
 0x32f   : > { %v3020_v27 = vpop.f32.mrf.mxu3  ;;  %1464 = vmatmul.bf16.gmra.mxu1 %v2815_v49  ;;  %v1546_v49 = vadd.f32 %v1545_v58, %v1531_v19 }
 0x330   : > { %v1793_v44 = vadd.f32 %v1792_v21, %v1778_v34 }
 0x331   : > { %v1547_v42 = vadd.f32 %v1546_v49, %v1532_v40 }
 0x332   : > { %v1794_v59 = vadd.f32 %v1793_v44, %v1779_v24 }
 0x333   : > { %v1548_v53 = vadd.f32 %v1547_v42, %v1533_v22 }
 0x334   : > { %v1795_v30 = vadd.f32 %v1794_v59, %v1780_v54 }
 0x335   : > { %v1549_v63 = vadd.f32 %v1548_v53, %v1534_v51 }
 0x336   : > { %v1796_v13 = vadd.f32 %v1795_v30, %v1781_v0 }
 0x337   : > { %v3027_v29 = vpop.f32.mrf.mxu3  ;;  %v1550_v9 = vadd.f32 %v1549_v63, %v1535_v61 }
 0x338   : > { %v1797_v8 = vadd.f32 %v1796_v13, %v1782_v10  ;;  %v1383_v2 = vpack.c.bf16 %v3027_v29, %v3027_v29 }
 0x339   : > { %v1551_v18 = vadd.f32 %v1550_v9, %v1536_v6  ;;  %v1381_v9 = vpack.c.bf16 %v3013_v47, %v3013_v47 }
 0x33a   : > { %v1798_v50 = vadd.f32 %v1797_v8, %v1783_v26  ;;  %v1667_v10 = vunpack.c.l.b16 %v1383_v2 }
 0x33b   : > { %v1552_v12 = vadd.f32 %v1551_v18, %v1537_v15  ;;  %v1665_v15 = vunpack.c.l.b16 %v1381_v9 }
 0x33c   : > { %v1799_v4 = vadd.f32 %v1798_v50, %v1784_v7 }
 0x33d   : > { %v1553_v57 = vrot.slane %v1552_v12, 4 }
 0x33e   : > { %v1800_v56 = vadd.f32 %v1799_v4, %v1785_v31 }
 0x33f   : > { %v1344_v11 = vpop.f32.mrf.mxu3  ;;  %1469 = vmatmul.bf16.gmra.mxu1 %v2819_v52  ;;  %v1554_v37 = vadd.f32 %v1553_v57, %v1552_v12  ;;  %v3089_v12 = vld [vmem:[%s3193_s5] ss:$0 sm:$0xff] }
 0x340   : > { %v1801_v58 = vrot.slane %v1800_v56, 4  ;;  %v1384_v61 = vpack.c.bf16 %v1344_v11, %v1344_v11 }
 0x341   : > { %v1555_v19 = vrot.slane %v1554_v37, 2 }
 0x342   : > { %v1802_v23 = vadd.f32 %v1801_v58, %v1800_v56  ;;  %v1668_v30 = vunpack.c.l.b16 %v1384_v61 }
 0x343   : > { %v1556_v60 = vadd.f32 %v1555_v19, %v1554_v37 }
 0x344   : > { %v1803_v52 = vrot.slane %v1802_v23, 2  ;;  %v1678_v13 = vpack.c.b16 %v1668_v30, %v1667_v10 }
 0x345   : > { %v1557_v62 = vrot.slane %v1556_v60, 1 }
 0x346   : > { %v1804_v49 = vadd.f32 %v1803_v52, %v1802_v23  ;;  %v2391_v23 = vld [vmem:[%s2785_s23 + $0x78] sm:$0xff] }
 0x347   : > { %v1347_v41 = vpop.f32.mrf.mxu3  ;;  %v1558_v39 = vadd.f32 %v1557_v62, %v1556_v60 }
 0x348   : > { %v1805_v21 = vrot.slane %v1804_v49, 1  ;;  %v1385_v53 = vpack.c.bf16 %v1347_v41, %v1347_v41  ;;  %v2390_v41 = vld [vmem:[%s2785_s23 + $0x70] sm:$0xff] }
 0x349   : > { %v1559_v34 = vpack.c.bf16 %v1558_v39, %v1558_v39 }
 0x34a   : > { %v1806_v22 = vadd.f32 %v1805_v21, %v1804_v49  ;;  %v1669_v3 = vunpack.c.l.b16 %v1385_v53 }
 0x34b   : > { %1568 = vmatmul.bf16.vlgmr.msrb.gmra.mxu3 %v1559_v34 }
 0x34c   : > { %v1807_v42 = vpack.c.bf16 %v1806_v22, %v1806_v22 }
 0x34e   : > { %1816 = vmatmul.bf16.vlgmr.msrb.gmra.mxu0 %v1807_v42  ;;  %v3112_v42 = vld [vmem:[%s3193_s5] ss:$0 sm:$0xff] }
 0x34f   : > { %v1349_v40 = vpop.f32.mrf.mxu3  ;;  %1474 = vmatmul.bf16.gmra.mxu1 %v2823_v55  ;;  %v2399_v55 = vld [vmem:[%s3194_s6 + $0x38] sm:$0xff] }
 0x350   : > { %v1386_v44 = vpack.c.bf16 %v1349_v40, %v1349_v40  ;;  %1896 = vmatpush.bf16.msra.mxu1 %v2399_v55 }
 0x352   : > { %v1670_v63 = vunpack.c.l.b16 %v1386_v44 }
 0x354   : > { %v1679_v6 = vpack.c.b16 %v1670_v63, %v1669_v3 }
 0x357   : > { %v1352_v24 = vpop.f32.mrf.mxu3 }
 0x358   : > { %v1387_v45 = vpack.c.bf16 %v1352_v24, %v1352_v24 }
 0x35a   : > { %v1671_v54 = vunpack.c.l.b16 %v1387_v45 }
 0x35f   : > { %v1354_v43 = vpop.f32.mrf.mxu3  ;;  %1479 = vmatmul.bf16.gmra.mxu1 %v2839_v1  ;;  %v1382_v1 = vpack.c.bf16 %v3020_v27, %v3020_v27  ;;  %v2398_v27 = vld [vmem:[%s3194_s6 + $0x30] sm:$0xff] }
 0x360   : > { %v1388_v51 = vpack.c.bf16 %v1354_v43, %v1354_v43  ;;  %1897 = vmatpush.bf16.msra.mxu1 %v2398_v27 }
 0x361   : > { %v1666_v11 = vunpack.c.l.b16 %v1382_v1 }
 0x362   : > { %v1672_v59 = vunpack.c.l.b16 %v1388_v51 }
 0x363   : > { %v1677_v29 = vpack.c.b16 %v1666_v11, %v1665_v15 }
 0x364   : > { %v1680_v0 = vpack.c.b16 %v1672_v59, %v1671_v54  ;;  %1898 = vmatpush.bf16.msra.mxu1 %v2397_v35 }
 0x366   : > { %1689 = vmatpush.bf16.msrb.mxu2 %v1680_v0 }
 0x368   : > { %1899 = vmatpush.bf16.msra.mxu1 %v2396_v25 }
 0x36a   : > { %1690 = vmatpush.bf16.msrb.mxu2 %v1679_v6 }
 0x36c   : > { %1900 = vmatpush.bf16.msra.mxu1 %v2395_v36 }
 0x36e   : > { %1691 = vmatpush.bf16.msrb.mxu2 %v1678_v13 }
 0x36f   : > { %1484 = vmatmul.bf16.gmra.mxu1 %v2855_v32  ;;  %v2384_v32 = vld [vmem:[%s2785_s23 + $0x40] sm:$0xff] }
 0x372   : > { %1692 = vmatpush.bf16.msrb.mxu2 %v1677_v29 }
 0x376   : > { %1693 = vmatpush.bf16.msrb.mxu2 %v1676_v17 }
 0x37a   : > { %1694 = vmatpush.bf16.msrb.mxu2 %v1675_v33  ;;  %v2392_v33 = vld [vmem:[%s3194_s6] sm:$0xff] }
 0x37c   : > { %v1450_v26 = vpop.f32.mrf.mxu1 }
 0x37d   : > { %v1451_v7 = vadd.f32 %v3089_v12, %v1450_v26 }
 0x37e   : > { %1695 = vmatpush.bf16.msrb.mxu2 %v1674_v16  ;;  %v2388_v16 = vld [vmem:[%s2785_s23 + $0x60] sm:$0xff]  ;;  %s350_s23 = sand.u32 1, %s2591_s10  }
 0x37f   : > { %s2035_s28 = sshll.u32 %s350_s23, 1  ;;  %s1916_s16 = scalar_lea.sflag [#allocation3], %s350_s23 }
 0x380   : > { %s352_s25 = scalar_lea.vmem [#allocation2], %s2035_s28 }
 0x381   : > { %s1932_s26 = sshll.u32 %s352_s25, 4  ;;  %s1933_s26 = int_to_ptr.vmem [resolvable:$true] %s1932_s26 }
 0x382   : > { %1696 = vmatpush.bf16.msrb.mxu2 %v1673_v46  ;;  %v2394_v46 = vld [vmem:[%s3194_s6 + $0x10] sm:$0xff] }
 0x383   : > { %1901 = vmatpush.bf16.msra.mxu1 %v2394_v46 }
 0x384   : > { %v1452_v31 = vpop.f32.mrf.mxu1 }
 0x385   : > { %1697 = vmatmul.bf16.vlgmr.msrb.gmra.mxu2 %v2384_v32  ;;  %v1453_v4 = vadd.f32 %v3089_v12, %v1452_v31 }
 0x387   : > { %1902 = vmatpush.bf16.msra.mxu1 %v2393_v5  ;;  %v2403_v37 = vpack.c.bf16 %v1453_v4, %v1451_v7 }
 0x389   : > { %2404 = vst [vmem:[%s3098_s27] sm:$0xff] %v2403_v37  }
 0x38b   : > { %1903 = vmatpush.bf16.msra.mxu1 %v2392_v33 }
 0x38c   : > { %v1455_v56 = vpop.f32.mrf.mxu1 }
 0x38d   : > { %v1456_v19 = vadd.f32 %v3089_v12, %v1455_v56 }
 0x394   : > { %v1457_v58 = vpop.f32.mrf.mxu1 }
 0x395   : > { %1702 = vmatmul.bf16.gmra.mxu2 %v2385_v38  ;;  %v1458_v60 = vadd.f32 %v3089_v12, %v1457_v58 }
 0x397   : > { %v2408_v62 = vpack.c.bf16 %v1458_v60, %v1456_v19 }
 0x399   : > { %2480 = vst [vmem:[%s3098_s27 + $0x8] sm:$0xff] %v2408_v62  }
 0x39c   : > { %v1460_v52 = vpop.f32.mrf.mxu1 }
 0x39d   : > { %v1461_v39 = vadd.f32 %v3089_v12, %v1460_v52 }
 0x3a4   : > { %v1462_v40 = vpop.f32.mrf.mxu1 }
 0x3a5   : > { %1707 = vmatmul.bf16.gmra.mxu2 %v2386_v14  ;;  %v1463_v49 = vadd.f32 %v3089_v12, %v1462_v40 }
 0x3a7   : > { %v2413_v34 = vpack.c.bf16 %v1463_v49, %v1461_v39 }
 0x3a9   : > { %2481 = vst [vmem:[%s3098_s27 + $0x10] sm:$0xff] %v2413_v34  }
 0x3ac   : > { %v1465_v21 = vpop.f32.mrf.mxu1 }
 0x3ad   : > { %v1466_v24 = vadd.f32 %v3089_v12, %v1465_v21 }
 0x3b4   : > { %v1467_v45 = vpop.f32.mrf.mxu1 }
 0x3b5   : > { %1712 = vmatmul.bf16.gmra.mxu2 %v2387_v48  ;;  %v1468_v43 = vadd.f32 %v3089_v12, %v1467_v45 }
 0x3b7   : > { %v2418_v54 = vpack.c.bf16 %v1468_v43, %v1466_v24 }
 0x3b9   : > { %2482 = vst [vmem:[%s3098_s27 + $0x18] sm:$0xff] %v2418_v54  }
 0x3bc   : > { %v1470_v61 = vpop.f32.mrf.mxu1 }
 0x3bd   : > { %v1471_v0 = vadd.f32 %v3089_v12, %v1470_v61 }
 0x3c4   : > { %v1472_v55 = vpop.f32.mrf.mxu1 }
 0x3c5   : > { %1717 = vmatmul.bf16.gmra.mxu2 %v2388_v16  ;;  %v1473_v2 = vadd.f32 %v3089_v12, %v1472_v55 }
 0x3c7   : > { %v2423_v6 = vpack.c.bf16 %v1473_v2, %v1471_v0 }
 0x3c9   : > { %2483 = vst [vmem:[%s3098_s27 + $0x20] sm:$0xff] %v2423_v6  }
 0x3cb   : > { %v1817_v17 = vpop.f32.mrf.mxu0 }
 0x3cc   : > { %v1822_v47 = vrot.slane %v1817_v17, 7  ;;  %v1475_v10 = vpop.f32.mrf.mxu1 }
 0x3cd   : > { %v1476_v13 = vadd.f32 %v3089_v12, %v1475_v10 }
 0x3ce   : > { %v1569_v18 = vpop.f32.mrf.mxu3 }
 0x3cf   : > { %v1825_v28 = vsel %vm1824_vm0, %v1569_v18, %v1822_v47 }
 0x3d0   : > { %v1826_v8 = vpack.c.bf16 %v1825_v28, %v1825_v28 }
 0x3d2   : > { %1904 = vmatmul.bf16.vlgmr.msra.gmra.mxu1 %v1826_v8 }
 0x3d3   : > { %v1819_v50 = vpop.f32.mrf.mxu0 }
 0x3d4   : > { %v1477_v15 = vpop.f32.mrf.mxu1 }
 0x3d5   : > { %1722 = vmatmul.bf16.gmra.mxu2 %v2389_v20  ;;  %v1478_v29 = vadd.f32 %v3089_v12, %v1477_v15 }
 0x3d6   : > { %v1571_v57 = vpop.f32.mrf.mxu3 }
 0x3d7   : > { %v2428_v38 = vpack.c.bf16 %v1478_v29, %v1476_v13 }
 0x3d9   : > { %2484 = vst [vmem:[%s3098_s27 + $0x28] sm:$0xff] %v2428_v38  }
 0x3dc   : > { %v1480_v14 = vpop.f32.mrf.mxu1 }
 0x3dd   : > { %v1481_v48 = vadd.f32 %v3089_v12, %v1480_v14 }
 0x3e4   : > { %v1482_v46 = vpop.f32.mrf.mxu1 }
 0x3e5   : > { %1727 = vmatmul.bf16.gmra.mxu2 %v2390_v41  ;;  %v1483_v16 = vadd.f32 %v3089_v12, %v1482_v46 }
 0x3e7   : > { %v2433_v17 = vpack.c.bf16 %v1483_v16, %v1481_v48 }
 0x3e9   : > { %2485 = vst [vmem:[%s3098_s27 + $0x30] sm:$0xff] %v2433_v17  }
 0x3ec   : > { %v1485_v18 = vpop.f32.mrf.mxu1 }
 0x3ed   : > { %v1486_v28 = vadd.f32 %v3089_v12, %v1485_v18 }
 0x3f4   : > { %v1487_v8 = vpop.f32.mrf.mxu1 }
 0x3f5   : > { %1732 = vmatmul.bf16.gmra.mxu2 %v2391_v23  ;;  %v1488_v7 = vadd.f32 %v3089_v12, %v1487_v8  ;;  %v1843_v12 = vld [vmem:[%s3195_s7] sm:$0x1] }
 0x3f6   : > { %v1844_v19 = vmul.f32 32.0, %v1843_v12 }
 0x3f7   : > { %v2438_v4 = vpack.c.bf16 %v1488_v7, %v1486_v28 }
 0x3f8   : > { %v1846_v58 = vperm.slane %v1844_v19, 0 }
 0x3f9   : > { %2486 = vst [vmem:[%s3098_s27 + $0x38] sm:$0xff] %v2438_v4  }
 0x408   : > { %v1698_v22 = vpop.f32.mrf.mxu2 }
 0x409   : > { %v1699_v51 = vadd.f32 %v3112_v42, %v1698_v22 }
 0x410   : > { %v1700_v44 = vpop.f32.mrf.mxu2 }
 0x411   : > { %v1701_v53 = vadd.f32 %v3112_v42, %v1700_v44 }
 0x413   : > { %v2443_v59 = vpack.c.bf16 %v1701_v53, %v1699_v51 }
 0x415   : > { %2487 = vst [vmem:[%s3098_s27 + $0x40] sm:$0xff] %v2443_v59  }
 0x418   : > { %v1703_v63 = vpop.f32.mrf.mxu2 }
 0x419   : > { %v1704_v1 = vadd.f32 %v3112_v42, %v1703_v63 }
 0x420   : > { %v1705_v3 = vpop.f32.mrf.mxu2 }
 0x421   : > { %v1706_v30 = vadd.f32 %v3112_v42, %v1705_v3 }
 0x423   : > { %v2448_v9 = vpack.c.bf16 %v1706_v30, %v1704_v1 }
 0x425   : > { %2488 = vst [vmem:[%s3098_s27 + $0x48] sm:$0xff] %v2448_v9  }
 0x428   : > { %v1708_v11 = vpop.f32.mrf.mxu2 }
 0x429   : > { %v1709_v32 = vadd.f32 %v3112_v42, %v1708_v11 }
 0x430   : > { %v1710_v27 = vpop.f32.mrf.mxu2 }
 0x431   : > { %v1711_v35 = vadd.f32 %v3112_v42, %v1710_v27 }
 0x433   : > { %v2453_v25 = vpack.c.bf16 %v1711_v35, %v1709_v32 }
 0x435   : > { %2489 = vst [vmem:[%s3098_s27 + $0x50] sm:$0xff] %v2453_v25  }
 0x438   : > { %v1713_v36 = vpop.f32.mrf.mxu2 }
 0x439   : > { %v1714_v20 = vadd.f32 %v3112_v42, %v1713_v36 }
 0x440   : > { %v1715_v5 = vpop.f32.mrf.mxu2 }
 0x441   : > { %v1716_v33 = vadd.f32 %v3112_v42, %v1715_v5 }
 0x443   : > { %v2458_v47 = vpack.c.bf16 %v1716_v33, %v1714_v20 }
 0x445   : > { %2490 = vst [vmem:[%s3098_s27 + $0x58] sm:$0xff] %v2458_v47  }
 0x448   : > { %v1718_v26 = vpop.f32.mrf.mxu2 }
 0x449   : > { %v1719_v57 = vadd.f32 %v3112_v42, %v1718_v26 }
 0x44f   : > { %v1905_v41 = vpop.f32.mrf.mxu1 }
 0x450   : > { %v1720_v50 = vpop.f32.mrf.mxu2  ;;  %v1906_v60 = vadd.f32 %v1905_v41, %v1846_v58 }
 0x451   : > { %v1721_v31 = vadd.f32 %v3112_v42, %v1720_v50 }
 0x452   : > { %1909 = vst [vmem:[%s352_s25] sm:$0x3] %v1906_v60 }
 0x453   : > { %v2463_v37 = vpack.c.bf16 %v1721_v31, %v1719_v57 }
 0x455   : > { %2491 = vst [vmem:[%s3098_s27 + $0x60] sm:$0xff] %v2463_v37  }
 0x457   : > { %v1907_v23 = vpop.f32.mrf.mxu1 }
 0x458   : > { %v1723_v56 = vpop.f32.mrf.mxu2 }
 0x459   : > { %v1724_v52 = vadd.f32 %v3112_v42, %v1723_v56 }
 0x460   : > { %v1725_v62 = vpop.f32.mrf.mxu2 }
 0x461   : > { %v1726_v39 = vadd.f32 %v3112_v42, %v1725_v62 }
 0x462   : > { %2564 = shalt.err (!%p2561_p4)
}
 0x463   : > { %2495 = dma.vmem_to_hbm [thread:$0]  (%p2689_p5), %s1933_s26, 32, %s1935_s29, %s1916_s16   ;;  %v2468_v40 = vpack.c.bf16 %v1726_v39, %v1724_v52 }
 0x465   : > { %2492 = vst [vmem:[%s3098_s27 + $0x68] sm:$0xff] %v2468_v40  }
 0x468   : > { %v1728_v49 = vpop.f32.mrf.mxu2 }
 0x469   : > { %v1729_v21 = vadd.f32 %v3112_v42, %v1728_v49 }
 0x470   : > { %v1730_v34 = vpop.f32.mrf.mxu2 }
 0x471   : > { %v1731_v22 = vadd.f32 %v3112_v42, %v1730_v34 }
 0x473   : > { %v2473_v24 = vpack.c.bf16 %v1731_v22, %v1729_v21 }
 0x475   : > { %2493 = vst [vmem:[%s3098_s27 + $0x70] sm:$0xff] %v2473_v24  }
 0x478   : > { %v1733_v45 = vpop.f32.mrf.mxu2 }
 0x479   : > { %v1734_v44 = vadd.f32 %v3112_v42, %v1733_v45 }
 0x480   : > { %v1735_v43 = vpop.f32.mrf.mxu2 }
 0x481   : > { %v1736_v51 = vadd.f32 %v3112_v42, %v1735_v43 }
 0x483   : > { %v2478_v53 = vpack.c.bf16 %v1736_v51, %v1734_v44 }
 0x485   : > { %2494 = vst [vmem:[%s3098_s27 + $0x78] sm:$0xff] %v2478_v53  }
 0x486 PF: > { %p2501_p5 = scmp.ge.s32.totalorder %s2599_s12, 2  ;;  %s1954_s19 = sand.u32 1, %s2587_s30  }
 0x487   : > { %s1955_s23 = scalar_lea.sflag [#allocation3], %s1954_s19 }
 0x488   : > { %p2498_p7 = pnand %p2501_p5, %p2693_p6 }
 0x48a   : > { %p2499_p8 = pneg %p2498_p7 }
 0x48c   : > { %2582 = dma.done.wait (%p2499_p8), %s1955_s23, 32  }
 0x48d   : > { %2584 = vsyncadd (%p2499_p8), %s1955_s23, 4294967264  ;;  %p20_p9 = scmp.ge.s32.totalorder %s2676_s15, 4   ;;  %s3200_s30 = smov %s2591_s10 }
 0x48e   : > { %s3201_s10 = smov %s2595_s11  ;;  %s3202_s11 = smov %s2687_s18 }
 0x48f   : > { %s3203_s12 = smov %s2676_s15  ;;  %22 = sbr.rel (!%p20_p9) target bundleno = 3 (0x3), region = 103 }
 0x494   :  { %1961 = vsyncpa [#allocation3], 1 }
 0x495   :  { %1963 = vsyncpa [#allocation3 + $0x1], 1 }

</bundles_post_ra>
